<compile_context>
chip_gen: v6e
topology: v6e:2x2x1
jax: 0.10.0
libtpu: 0.0.40
codegen_flags: <defaults>
</compile_context>

<pallas_src>
import functools
import math

import jax
import jax.numpy as jnp
from jax import lax
from jax.experimental import pallas as pl
from jax.experimental.pallas import tpu as pltpu

_EPS = 1e-5                       # nn.BatchNorm2d default eps
_HALO = 128                       # lane halo fetched on each side of a tile
_VMEM_LIMIT = 32 * 1024 * 1024    # safe on v5e/v6e (128 MiB) and v7x (64 MiB)


def _round_up(x, d):
    return (x + d - 1) // d * d


def _gelu(x):
    # tanh-form GELU: one EUP tanh + a few VALU ops; |err| vs exact erf-GELU
    # ~3e-4, far below the bf16-dominated error budget.
    c = math.sqrt(2.0 / math.pi)
    return 0.5 * x * (1.0 + jnp.tanh(c * (x + 0.044715 * x * x * x)))


# --------------------------------- kernels ---------------------------------- #
def _conv_stats_kernel(*refs, wpad, tm, pre_act):
    if pre_act:
        (xprev, xmain, xnext, mprev, mmain, mnext, wref, scref, shref,
         y_ref, sum_ref, ssq_ref) = refs
    else:
        (xprev, xmain, xnext, mmain, wref, y_ref, sum_ref, ssq_ref) = refs

    # lane-haloed activation window for this tile: (C, _HALO + tm + _HALO)
    xa = jnp.concatenate([xprev[...], xmain[...], xnext[...]], axis=1)

    if pre_act:
        # fused BatchNorm + GELU of the *previous* layer, applied to the main
        # tile and both halos.  `where` (a select, not a multiply) guarantees
        # uninitialized halo garbage at the canonical pad tiles can never leak.
        ma = jnp.concatenate([mprev[...], mmain[...], mnext[...]], axis=1)
        act = _gelu(xa.astype(jnp.float32) * scref[...] + shref[...])
        xa = jnp.where(ma > 0.5, act, 0.0)
    xa = xa.astype(jnp.bfloat16)

    # in-VMEM im2col: 25 statically shifted lane-slices stacked on the
    # contraction axis -> a single MXU matmul with K = 25*C.
    taps = []
    for ky in range(5):
        for kx in range(5):
            off = _HALO + (ky - 2) * wpad + (kx - 2)
            taps.append(xa[:, off:off + tm])
    pT = jnp.concatenate(taps, axis=0)                         # (25*C, tm) bf16
    acc = jnp.dot(wref[...], pT, preferred_element_type=jnp.float32)

    # zero padded / out-of-image output pixels (they double as the zero padding
    # of the next conv layer) and accumulate masked BatchNorm statistics.
    acc = acc * mmain[...]
    y_ref[...] = acc.astype(y_ref.dtype)

    @pl.when(pl.program_id(1) == 0)
    def _init():
        sum_ref[...] = jnp.zeros_like(sum_ref)
        ssq_ref[...] = jnp.zeros_like(ssq_ref)

    sum_ref[...] += jnp.sum(acc, axis=1, keepdims=True)
    ssq_ref[...] += jnp.sum(acc * acc, axis=1, keepdims=True)


def _epilogue_kernel(*refs, has_proj):
    if has_proj:
        y2, scref, shref, xref, wsk, bsk, out_ref = refs
        skip = jnp.dot(wsk[...], xref[...],
                       preferred_element_type=jnp.float32) + bsk[...]
    else:
        y2, scref, shref, xref, out_ref = refs
        skip = xref[...]
    yhat = y2[...].astype(jnp.float32) * scref[...] + shref[...]
    out_ref[...] = (skip + _gelu(yhat)).astype(out_ref.dtype)


# ----------------------------- pallas_call wrappers -------------------------- #
def _conv_stats(act_can, mask_can, w_packed, scale, shift, *,
                tm, n_shards, tiles_per_shard, wpad, cout, L, pre_act):
    cin_rows = act_can.shape[0]
    T = tiles_per_shard
    hb = tm // _HALO

    def lin(s, i):
        return s * T + i

    main_map = lambda s, i: (0, 1 + lin(s, i))
    prev_map = lambda s, i: (0, (1 + lin(s, i)) * hb - 1)
    next_map = lambda s, i: (0, (2 + lin(s, i)) * hb)
    zero2 = lambda s, i: (0, 0)
    stat_map = lambda s, i: (s, 0)

    in_specs = [pl.BlockSpec((cin_rows, _HALO), prev_map),
                pl.BlockSpec((cin_rows, tm), main_map),
                pl.BlockSpec((cin_rows, _HALO), next_map)]
    args = [act_can, act_can, act_can]
    if pre_act:
        in_specs += [pl.BlockSpec((1, _HALO), prev_map),
                     pl.BlockSpec((1, tm), main_map),
                     pl.BlockSpec((1, _HALO), next_map)]
        args += [mask_can, mask_can, mask_can]
    else:
        in_specs += [pl.BlockSpec((1, tm), main_map)]
        args += [mask_can]
    in_specs += [pl.BlockSpec(w_packed.shape, zero2)]
    args += [w_packed]
    if pre_act:
        in_specs += [pl.BlockSpec((cout, 1), zero2),
                     pl.BlockSpec((cout, 1), zero2)]
        args += [scale, shift]

    kern = functools.partial(_conv_stats_kernel, wpad=wpad, tm=tm, pre_act=pre_act)
    return pl.pallas_call(
        kern,
        grid=(n_shards, T),
        in_specs=in_specs,
        out_specs=(pl.BlockSpec((cout, tm), main_map),
                   pl.BlockSpec((cout, 1), stat_map),
                   pl.BlockSpec((cout, 1), stat_map)),
        out_shape=(jax.ShapeDtypeStruct((cout, L), jnp.bfloat16),
                   jax.ShapeDtypeStruct((n_shards * cout, 1), jnp.float32),
                   jax.ShapeDtypeStruct((n_shards * cout, 1), jnp.float32)),
        compiler_params=pltpu.CompilerParams(
            dimension_semantics=("parallel", "arbitrary"),
            vmem_limit_bytes=_VMEM_LIMIT),
    )(*args)


def _bn_fold(s_part, q_part, gamma, beta, m_true, n_shards, cout):
    # glue, O(Cout): reduce per-shard partials, fold into scale/shift.
    # NOTE: E[y^2]-E[y]^2 can cancel for huge M / large means; fine at these
    # sizes (see review correctness note).
    s = s_part.reshape(n_shards, cout, 1).sum(axis=0)
    q = q_part.reshape(n_shards, cout, 1).sum(axis=0)
    mean = s / m_true
    var = q / m_true - mean * mean
    scale = gamma * lax.rsqrt(var + _EPS)
    shift = beta - mean * scale
    return scale, shift


def _epilogue(y2, sc2, sh2, x_can, wskip, bskip, *, tm, ntiles, cout, Lmain):
    cin = x_can.shape[0]
    has_proj = wskip is not None
    in_specs = [pl.BlockSpec((cout, tm), lambda t: (0, 1 + t)),
                pl.BlockSpec((cout, 1), lambda t: (0, 0)),
                pl.BlockSpec((cout, 1), lambda t: (0, 0)),
                pl.BlockSpec((cin, tm), lambda t: (0, 1 + t))]
    args = [y2, sc2, sh2, x_can]
    if has_proj:
        in_specs += [pl.BlockSpec((cout, cin), lambda t: (0, 0)),
                     pl.BlockSpec((cout, 1), lambda t: (0, 0))]
        args += [wskip, bskip]
    kern = functools.partial(_epilogue_kernel, has_proj=has_proj)
    return pl.pallas_call(
        kern,
        grid=(ntiles,),
        in_specs=in_specs,
        out_specs=pl.BlockSpec((cout, tm), lambda t: (0, t)),
        out_shape=jax.ShapeDtypeStruct((cout, Lmain), jnp.float32),
        compiler_params=pltpu.CompilerParams(
            dimension_semantics=("parallel",),
            vmem_limit_bytes=_VMEM_LIMIT),
    )(*args)


# ------------------------------- forward wrapper ----------------------------- #
def residual_block_forward(x_nchw, params, *, tm=None, num_shards=2):
    n, cin, h, w = x_nchw.shape
    cout = params["w1"].shape[0]
    hpad, wpad = h + 4, w + 4
    P = hpad * wpad
    m_pad = n * P                    # conv computed on the padded pixel grid
    m_true = float(n * h * w)        # real pixels (BatchNorm divisor)

    assert 2 * wpad + 2 <= _HALO, "padded width too large for the 128-lane halo"

    if tm is None:
        tm = min(2048, _round_up(m_pad, 128))
    assert tm % _HALO == 0, "M-tile must be lane-aligned (multiple of 128)"

    ntiles = pl.cdiv(m_pad, tm)
    S = num_shards if (num_shards > 0 and ntiles >= num_shards) else 1
    ntiles = _round_up(ntiles, S)
    T = ntiles // S
    Lmain = ntiles * tm
    L = Lmain + 2 * tm               # + front/back pad tiles (halo landing zone)

    # --- canonical channels-major layout (wrapper glue, ~1x activation) ------ #
    xp = jnp.pad(jnp.transpose(x_nchw, (0, 2, 3, 1)).astype(jnp.float32),
                 ((0, 0), (2, 2), (2, 2), (0, 0)))             # (N, Hp, Wp, Cin)
    x_flat = xp.reshape(m_pad, cin).T                           # (Cin, N*Hp*Wp)
    x_can = jnp.pad(x_flat, ((0, 0), (tm, L - tm - m_pad)))     # (Cin, L) f32

    j = jnp.arange(Lmain, dtype=jnp.int32)
    r = j % P
    hh = r // wpad
    ww = r % wpad
    valid = ((j < m_pad) & (hh >= 2) & (hh < h + 2) & (ww >= 2) & (ww < w + 2))
    mask_can = jnp.pad(valid.astype(jnp.float32)[None, :], ((0, 0), (tm, tm)))

    # --- layer 1: conv5x5 + batch stats -------------------------------------- #
    y1, s1, q1 = _conv_stats(x_can, mask_can,
                             params["w1"].astype(jnp.bfloat16), None, None,
                             tm=tm, n_shards=S, tiles_per_shard=T, wpad=wpad,
                             cout=cout, L=L, pre_act=False)
    sc1, sh1 = _bn_fold(s1, q1, params["g1"], params["be1"], m_true, S, cout)

    # --- layer 2: (fused BN1+GELU) -> conv5x5 + batch stats ------------------- #
    y2, s2, q2 = _conv_stats(y1, mask_can,
                             params["w2"].astype(jnp.bfloat16), sc1, sh1,
                             tm=tm, n_shards=S, tiles_per_shard=T, wpad=wpad,
                             cout=cout, L=L, pre_act=True)
    sc2, sh2 = _bn_fold(s2, q2, params["g2"], params["be2"], m_true, S, cout)

    # --- epilogue: BN2 + GELU + skip ------------------------------------------ #
    out_flat = _epilogue(y2, sc2, sh2, x_can,
                         params.get("wskip"), params.get("bskip"),
                         tm=tm, ntiles=ntiles, cout=cout, Lmain=Lmain)

    out = out_flat[:, :m_pad].reshape(cout, n, hpad, wpad)[:, :, 2:2 + h, 2:2 + w]
    return jnp.transpose(out, (1, 0, 2, 3))                     # NCHW


# ------------------------------- parameter init ------------------------------ #
def init_params(key, cin, cout):
    ks = jax.random.split(key, 6)

    def uconv(k, shape, fan_in):
        bound = 1.0 / math.sqrt(fan_in)
        return jax.random.uniform(k, shape, jnp.float32, -bound, bound)

    params = {
        # conv weights packed channels-major: (Cout, 25*Cin), col = tap*Cin + ci
        "w1": uconv(ks[0], (cout, 25 * cin), cin * 25),
        "b1": uconv(ks[1], (cout,), cin * 25),    # reference only: cancels under BN
        "g1": jnp.ones((cout, 1), jnp.float32),
        "be1": jnp.zeros((cout, 1), jnp.float32),
        "w2": uconv(ks[2], (cout, 25 * cout), cout * 25),
        "b2": uconv(ks[3], (cout,), cout * 25),   # reference only: cancels under BN
        "g2": jnp.ones((cout, 1), jnp.float32),
        "be2": jnp.zeros((cout, 1), jnp.float32),
    }
    if cin != cout:   # nn.Conv2d(cin, cout, kernel_size=1) skip
        params["wskip"] = uconv(ks[4], (cout, cin), cin)
        params["bskip"] = uconv(ks[5], (cout, 1), cin)
    return params


# ---------------------------------- pure-JAX ref ------------------------------ #
def _reference(x_nchw, params):
    x = jnp.transpose(x_nchw, (0, 2, 3, 1)).astype(jnp.float32)

    def conv5(x_, wT, b):
        co = wT.shape[0]
        ci = wT.shape[1] // 25
        w_ = wT.reshape(co, 5, 5, ci).transpose(1, 2, 3, 0)     # -> HWIO
        y = lax.conv_general_dilated(x_, w_, (1, 1), "SAME",
                                     dimension_numbers=("NHWC", "HWIO", "NHWC"))
        return y + b.reshape(1, 1, 1, -1)

    def bn_gelu(y, g, be):
        mean = jnp.mean(y, axis=(0, 1, 2), keepdims=True)
        var = jnp.mean((y - mean) ** 2, axis=(0, 1, 2), keepdims=True)
        yh = (y - mean) * lax.rsqrt(var + _EPS) * g.reshape(1, 1, 1, -1) \
            + be.reshape(1, 1, 1, -1)
        return jax.nn.gelu(yh, approximate=False)

    h1 = bn_gelu(conv5(x, params["w1"], params["b1"]), params["g1"], params["be1"])
    h2 = bn_gelu(conv5(h1, params["w2"], params["b2"]), params["g2"], params["be2"])
    if "wskip" in params:
        skip = jnp.einsum("nhwc,oc->nhwo", x, params["wskip"]) \
            + params["bskip"].reshape(1, 1, 1, -1)
    else:
        skip = x
    return jnp.transpose(skip + h2, (0, 3, 1, 2))


# ------------------------------------- main ----------------------------------- #
if __name__ == "__main__":
    key = jax.random.PRNGKey(0)
    kx1, kp1, kx2, kp2 = jax.random.split(key, 4)

    fwd = jax.jit(residual_block_forward, static_argnames=("tm", "num_shards"))

    # Case 1: cin != cout -> 1x1-conv projection skip.  tm=256 gives 4 M-tiles
    # split over 2 stat shards, exercising the multi-tile BN-stats accumulator
    # and the megacore-parallel shard axis.
    N, CIN, COUT, H, W = 2, 4, 8, 16, 16
    x = jax.random.normal(kx1, (N, CIN, H, W), jnp.float32)     # NCHW, like PyTorch
    params = init_params(kp1, CIN, COUT)
    out = jax.block_until_ready(fwd(x, params, tm=256))
    ref = jax.block_until_ready(_reference(x, params))
    assert out.shape == (N, COUT, H, W), out.shape
    err = float(jnp.max(jnp.abs(out - ref)))
    # bf16 MXU inputs + bf16 conv-output storage (f32 accumulation / BN / GELU)
    assert err < 5e-2, f"case1 max abs err {err}"

    # Case 2: cin == cout -> identity skip; default (single) tile size.
    x2 = jax.random.normal(kx2, (N, COUT, H, W), jnp.float32)
    params2 = init_params(kp2, COUT, COUT)
    out2 = jax.block_until_ready(fwd(x2, params2))
    ref2 = jax.block_until_ready(_reference(x2, params2))
    err2 = float(jnp.max(jnp.abs(out2 - ref2)))
    assert err2 < 5e-2, f"case2 max abs err {err2}"

    print("KERNEL_OK")
</pallas_src>

<mosaic_0001>
module attributes {stable_mosaic.version = 11 : i64} {
  func.func @_conv_stats_kernel(%arg0: i32, %arg1: i32, %arg2: memref<4x128xf32, #tpu.memory_space<vmem>>, %arg3: memref<4x256xf32, #tpu.memory_space<vmem>>, %arg4: memref<4x128xf32, #tpu.memory_space<vmem>>, %arg5: memref<1x256xf32, #tpu.memory_space<vmem>>, %arg6: memref<8x100xbf16, #tpu.memory_space<vmem>>, %arg7: memref<8x256xbf16, #tpu.memory_space<vmem>>, %arg8: memref<8x1xf32, #tpu.memory_space<vmem>>, %arg9: memref<8x1xf32, #tpu.memory_space<vmem>>) attributes {dimension_semantics = [#tpu.dimension_semantics<parallel>, #tpu.dimension_semantics<arbitrary>], iteration_bounds = array<i64: 2, 2>, scalar_prefetch = 0 : i64, scratch_operands = 0 : i64, tpu.core_type = #tpu.core_type<tc>, window_params = [{transform_indices = @transform_0, window_bounds = array<i64: 4, 128>}, {transform_indices = @transform_1, window_bounds = array<i64: 4, 256>}, {transform_indices = @transform_2, window_bounds = array<i64: 4, 128>}, {transform_indices = @transform_3, window_bounds = array<i64: 1, 256>}, {pipeline_mode = #tpu.pipeline_mode<synchronous>, transform_indices = @transform_4, window_bounds = array<i64: 8, 100>}, {transform_indices = @transform_5, window_bounds = array<i64: 8, 256>}, {transform_indices = @transform_6, window_bounds = array<i64: 8, 1>}, {transform_indices = @transform_7, window_bounds = array<i64: 8, 1>}]} {
    %c0 = arith.constant 0 : index
    %c0_0 = arith.constant 0 : index
    %0 = vector.load %arg2[%c0, %c0_0] : memref<4x128xf32, #tpu.memory_space<vmem>>, vector<4x128xf32>
    %c0_1 = arith.constant 0 : index
    %c0_2 = arith.constant 0 : index
    %1 = vector.load %arg3[%c0_1, %c0_2] : memref<4x256xf32, #tpu.memory_space<vmem>>, vector<4x256xf32>
    %c0_3 = arith.constant 0 : index
    %c0_4 = arith.constant 0 : index
    %2 = vector.load %arg4[%c0_3, %c0_4] : memref<4x128xf32, #tpu.memory_space<vmem>>, vector<4x128xf32>
    %3 = tpu.concatenate %0, %1, %2 in 1 : vector<4x128xf32>, vector<4x256xf32>, vector<4x128xf32> -> vector<4x512xf32>
    %4 = arith.truncf %3 : vector<4x512xf32> to vector<4x512xbf16>
    %5 = vector.extract_strided_slice %4 {offsets = [0, 86], sizes = [4, 256], strides = [1, 1]} : vector<4x512xbf16> to vector<4x256xbf16>
    %6 = vector.extract_strided_slice %4 {offsets = [0, 87], sizes = [4, 256], strides = [1, 1]} : vector<4x512xbf16> to vector<4x256xbf16>
    %7 = vector.extract_strided_slice %4 {offsets = [0, 88], sizes = [4, 256], strides = [1, 1]} : vector<4x512xbf16> to vector<4x256xbf16>
    %8 = vector.extract_strided_slice %4 {offsets = [0, 89], sizes = [4, 256], strides = [1, 1]} : vector<4x512xbf16> to vector<4x256xbf16>
    %9 = vector.extract_strided_slice %4 {offsets = [0, 90], sizes = [4, 256], strides = [1, 1]} : vector<4x512xbf16> to vector<4x256xbf16>
    %10 = vector.extract_strided_slice %4 {offsets = [0, 106], sizes = [4, 256], strides = [1, 1]} : vector<4x512xbf16> to vector<4x256xbf16>
    %11 = vector.extract_strided_slice %4 {offsets = [0, 107], sizes = [4, 256], strides = [1, 1]} : vector<4x512xbf16> to vector<4x256xbf16>
    %12 = vector.extract_strided_slice %4 {offsets = [0, 108], sizes = [4, 256], strides = [1, 1]} : vector<4x512xbf16> to vector<4x256xbf16>
    %13 = vector.extract_strided_slice %4 {offsets = [0, 109], sizes = [4, 256], strides = [1, 1]} : vector<4x512xbf16> to vector<4x256xbf16>
    %14 = vector.extract_strided_slice %4 {offsets = [0, 110], sizes = [4, 256], strides = [1, 1]} : vector<4x512xbf16> to vector<4x256xbf16>
    %15 = vector.extract_strided_slice %4 {offsets = [0, 126], sizes = [4, 256], strides = [1, 1]} : vector<4x512xbf16> to vector<4x256xbf16>
    %16 = vector.extract_strided_slice %4 {offsets = [0, 127], sizes = [4, 256], strides = [1, 1]} : vector<4x512xbf16> to vector<4x256xbf16>
    %17 = vector.extract_strided_slice %4 {offsets = [0, 128], sizes = [4, 256], strides = [1, 1]} : vector<4x512xbf16> to vector<4x256xbf16>
    %18 = vector.extract_strided_slice %4 {offsets = [0, 129], sizes = [4, 256], strides = [1, 1]} : vector<4x512xbf16> to vector<4x256xbf16>
    %19 = vector.extract_strided_slice %4 {offsets = [0, 130], sizes = [4, 256], strides = [1, 1]} : vector<4x512xbf16> to vector<4x256xbf16>
    %20 = vector.extract_strided_slice %4 {offsets = [0, 146], sizes = [4, 256], strides = [1, 1]} : vector<4x512xbf16> to vector<4x256xbf16>
    %21 = vector.extract_strided_slice %4 {offsets = [0, 147], sizes = [4, 256], strides = [1, 1]} : vector<4x512xbf16> to vector<4x256xbf16>
    %22 = vector.extract_strided_slice %4 {offsets = [0, 148], sizes = [4, 256], strides = [1, 1]} : vector<4x512xbf16> to vector<4x256xbf16>
    %23 = vector.extract_strided_slice %4 {offsets = [0, 149], sizes = [4, 256], strides = [1, 1]} : vector<4x512xbf16> to vector<4x256xbf16>
    %24 = vector.extract_strided_slice %4 {offsets = [0, 150], sizes = [4, 256], strides = [1, 1]} : vector<4x512xbf16> to vector<4x256xbf16>
    %25 = vector.extract_strided_slice %4 {offsets = [0, 166], sizes = [4, 256], strides = [1, 1]} : vector<4x512xbf16> to vector<4x256xbf16>
    %26 = vector.extract_strided_slice %4 {offsets = [0, 167], sizes = [4, 256], strides = [1, 1]} : vector<4x512xbf16> to vector<4x256xbf16>
    %27 = vector.extract_strided_slice %4 {offsets = [0, 168], sizes = [4, 256], strides = [1, 1]} : vector<4x512xbf16> to vector<4x256xbf16>
    %28 = vector.extract_strided_slice %4 {offsets = [0, 169], sizes = [4, 256], strides = [1, 1]} : vector<4x512xbf16> to vector<4x256xbf16>
    %29 = vector.extract_strided_slice %4 {offsets = [0, 170], sizes = [4, 256], strides = [1, 1]} : vector<4x512xbf16> to vector<4x256xbf16>
    %30 = tpu.concatenate %5, %6, %7, %8, %9, %10, %11, %12, %13, %14, %15, %16, %17, %18, %19, %20 in 0 : vector<4x256xbf16>, vector<4x256xbf16>, vector<4x256xbf16>, vector<4x256xbf16>, vector<4x256xbf16>, vector<4x256xbf16>, vector<4x256xbf16>, vector<4x256xbf16>, vector<4x256xbf16>, vector<4x256xbf16>, vector<4x256xbf16>, vector<4x256xbf16>, vector<4x256xbf16>, vector<4x256xbf16>, vector<4x256xbf16>, vector<4x256xbf16> -> vector<64x256xbf16>
    %31 = tpu.concatenate %21, %22, %23, %24, %25, %26, %27, %28, %29 in 0 : vector<4x256xbf16>, vector<4x256xbf16>, vector<4x256xbf16>, vector<4x256xbf16>, vector<4x256xbf16>, vector<4x256xbf16>, vector<4x256xbf16>, vector<4x256xbf16>, vector<4x256xbf16> -> vector<36x256xbf16>
    %32 = tpu.concatenate %30, %31 in 0 : vector<64x256xbf16>, vector<36x256xbf16> -> vector<100x256xbf16>
    %c0_5 = arith.constant 0 : index
    %c0_6 = arith.constant 0 : index
    %33 = vector.load %arg6[%c0_5, %c0_6] : memref<8x100xbf16, #tpu.memory_space<vmem>>, vector<8x100xbf16>
    %cst = arith.constant dense<0.000000e+00> : vector<8x256xf32>
    %34 = tpu.matmul %33, %32, %cst {dimension_numbers = #tpu.dot_dimension_numbers<[1], [0], [0], [1], [0, 0, 1, 1], [], []>} : vector<8x100xbf16>, vector<100x256xbf16>, vector<8x256xf32> -> vector<8x256xf32>
    %c0_7 = arith.constant 0 : index
    %c0_8 = arith.constant 0 : index
    %35 = vector.load %arg5[%c0_7, %c0_8] : memref<1x256xf32, #tpu.memory_space<vmem>>, vector<1x256xf32>
    %36 = vector.broadcast %35 : vector<1x256xf32> to vector<8x256xf32>
    %37 = arith.mulf %34, %36 : vector<8x256xf32>
    %38 = arith.truncf %37 : vector<8x256xf32> to vector<8x256xbf16>
    %c0_9 = arith.constant 0 : index
    %c0_10 = arith.constant 0 : index
    %39 = vector.load %arg7[%c0_9, %c0_10] : memref<8x256xbf16, #tpu.memory_space<vmem>>, vector<8x256xbf16>
    tpu.vector_store %arg7[%c0_9, %c0_10], %38 {strides = array<i32>} : memref<8x256xbf16, #tpu.memory_space<vmem>>, vector<8x256xbf16>,
    %c0_i32 = arith.constant 0 : i32
    %40 = arith.cmpi eq, %arg1, %c0_i32 : i32
    %41 = arith.extui %40 : i1 to i32
    %c0_i32_11 = arith.constant 0 : i32
    %42 = arith.cmpi ne, %41, %c0_i32_11 : i32
    scf.if %42 {
      %cst_22 = arith.constant 0.000000e+00 : f32
      %54 = vector.broadcast %cst_22 : f32 to vector<8x1xf32>
      %c0_23 = arith.constant 0 : index
      %c0_24 = arith.constant 0 : index
      %55 = vector.load %arg8[%c0_23, %c0_24] : memref<8x1xf32, #tpu.memory_space<vmem>>, vector<8x1xf32>
      tpu.vector_store %arg8[%c0_23, %c0_24], %54 {strides = array<i32>} : memref<8x1xf32, #tpu.memory_space<vmem>>, vector<8x1xf32>,
      %cst_25 = arith.constant 0.000000e+00 : f32
      %56 = vector.broadcast %cst_25 : f32 to vector<8x1xf32>
      %c0_26 = arith.constant 0 : index
      %c0_27 = arith.constant 0 : index
      %57 = vector.load %arg9[%c0_26, %c0_27] : memref<8x1xf32, #tpu.memory_space<vmem>>, vector<8x1xf32>
      tpu.vector_store %arg9[%c0_26, %c0_27], %56 {strides = array<i32>} : memref<8x1xf32, #tpu.memory_space<vmem>>, vector<8x1xf32>,
    } else {
    }
    %c0_12 = arith.constant 0 : index
    %c0_13 = arith.constant 0 : index
    %43 = vector.load %arg8[%c0_12, %c0_13] : memref<8x1xf32, #tpu.memory_space<vmem>>, vector<8x1xf32>
    %cst_14 = arith.constant dense<0.000000e+00> : vector<8xf32>
    %44 = vector.multi_reduction <add>, %37, %cst_14 [1] : vector<8x256xf32> to vector<8xf32>
    %45 = vector.shape_cast %44 : vector<8xf32> to vector<8x1xf32>
    %46 = arith.addf %43, %45 : vector<8x1xf32>
    %c0_15 = arith.constant 0 : index
    %c0_16 = arith.constant 0 : index
    %47 = vector.load %arg8[%c0_15, %c0_16] : memref<8x1xf32, #tpu.memory_space<vmem>>, vector<8x1xf32>
    tpu.vector_store %arg8[%c0_15, %c0_16], %46 {strides = array<i32>} : memref<8x1xf32, #tpu.memory_space<vmem>>, vector<8x1xf32>,
    %c0_17 = arith.constant 0 : index
    %c0_18 = arith.constant 0 : index
    %48 = vector.load %arg9[%c0_17, %c0_18] : memref<8x1xf32, #tpu.memory_space<vmem>>, vector<8x1xf32>
    %49 = arith.mulf %37, %37 : vector<8x256xf32>
    %cst_19 = arith.constant dense<0.000000e+00> : vector<8xf32>
    %50 = vector.multi_reduction <add>, %49, %cst_19 [1] : vector<8x256xf32> to vector<8xf32>
    %51 = vector.shape_cast %50 : vector<8xf32> to vector<8x1xf32>
    %52 = arith.addf %48, %51 : vector<8x1xf32>
    %c0_20 = arith.constant 0 : index
    %c0_21 = arith.constant 0 : index
    %53 = vector.load %arg9[%c0_20, %c0_21] : memref<8x1xf32, #tpu.memory_space<vmem>>, vector<8x1xf32>
    tpu.vector_store %arg9[%c0_20, %c0_21], %52 {strides = array<i32>} : memref<8x1xf32, #tpu.memory_space<vmem>>, vector<8x1xf32>,
    return
  }
  func.func @transform_0(%arg0: i32, %arg1: i32) -> (i32, i32) {
    %c2_i32 = arith.constant 2 : i32
    %0 = arith.muli %arg0, %c2_i32 : i32
    %1 = arith.addi %0, %arg1 : i32
    %c1_i32 = arith.constant 1 : i32
    %2 = arith.addi %c1_i32, %1 : i32
    %c2_i32_0 = arith.constant 2 : i32
    %3 = arith.muli %2, %c2_i32_0 : i32
    %c1_i32_1 = arith.constant 1 : i32
    %4 = arith.subi %3, %c1_i32_1 : i32
    %c0_i32 = arith.constant 0 : i32
    %c0_i32_2 = arith.constant 0 : i32
    return %c0_i32, %4 : i32, i32
  }
  func.func @transform_1(%arg0: i32, %arg1: i32) -> (i32, i32) {
    %c2_i32 = arith.constant 2 : i32
    %0 = arith.muli %arg0, %c2_i32 : i32
    %1 = arith.addi %0, %arg1 : i32
    %c1_i32 = arith.constant 1 : i32
    %2 = arith.addi %c1_i32, %1 : i32
    %c0_i32 = arith.constant 0 : i32
    %c0_i32_0 = arith.constant 0 : i32
    return %c0_i32, %2 : i32, i32
  }
  func.func @transform_2(%arg0: i32, %arg1: i32) -> (i32, i32) {
    %c2_i32 = arith.constant 2 : i32
    %0 = arith.muli %arg0, %c2_i32 : i32
    %1 = arith.addi %0, %arg1 : i32
    %c2_i32_0 = arith.constant 2 : i32
    %2 = arith.addi %c2_i32_0, %1 : i32
    %c2_i32_1 = arith.constant 2 : i32
    %3 = arith.muli %2, %c2_i32_1 : i32
    %c0_i32 = arith.constant 0 : i32
    %c0_i32_2 = arith.constant 0 : i32
    return %c0_i32, %3 : i32, i32
  }
  func.func @transform_3(%arg0: i32, %arg1: i32) -> (i32, i32) {
    %c2_i32 = arith.constant 2 : i32
    %0 = arith.muli %arg0, %c2_i32 : i32
    %1 = arith.addi %0, %arg1 : i32
    %c1_i32 = arith.constant 1 : i32
    %2 = arith.addi %c1_i32, %1 : i32
    %c0_i32 = arith.constant 0 : i32
    %c0_i32_0 = arith.constant 0 : i32
    return %c0_i32, %2 : i32, i32
  }
  func.func @transform_4(%arg0: i32, %arg1: i32) -> (i32, i32) {
    %c0_i32 = arith.constant 0 : i32
    %c0_i32_0 = arith.constant 0 : i32
    %c0_i32_1 = arith.constant 0 : i32
    return %c0_i32, %c0_i32_0 : i32, i32
  }
  func.func @transform_5(%arg0: i32, %arg1: i32) -> (i32, i32) {
    %c2_i32 = arith.constant 2 : i32
    %0 = arith.muli %arg0, %c2_i32 : i32
    %1 = arith.addi %0, %arg1 : i32
    %c1_i32 = arith.constant 1 : i32
    %2 = arith.addi %c1_i32, %1 : i32
    %c0_i32 = arith.constant 0 : i32
    %c0_i32_0 = arith.constant 0 : i32
    return %c0_i32, %2 : i32, i32
  }
  func.func @transform_6(%arg0: i32, %arg1: i32) -> (i32, i32) {
    %c0_i32 = arith.constant 0 : i32
    %c0_i32_0 = arith.constant 0 : i32
    return %arg0, %c0_i32 : i32, i32
  }
  func.func @transform_7(%arg0: i32, %arg1: i32) -> (i32, i32) {
    %c0_i32 = arith.constant 0 : i32
    %c0_i32_0 = arith.constant 0 : i32
    return %arg0, %c0_i32 : i32, i32
  }
}

module attributes {stable_mosaic.version = 11 : i64} {
  func.func @_epilogue_kernel(%arg0: i32, %arg1: memref<8x256xbf16, #tpu.memory_space<vmem>>, %arg2: memref<8x1xf32, #tpu.memory_space<vmem>>, %arg3: memref<8x1xf32, #tpu.memory_space<vmem>>, %arg4: memref<4x256xf32, #tpu.memory_space<vmem>>, %arg5: memref<8x4xf32, #tpu.memory_space<vmem>>, %arg6: memref<8x1xf32, #tpu.memory_space<vmem>>, %arg7: memref<8x256xf32, #tpu.memory_space<vmem>>) attributes {dimension_semantics = [#tpu.dimension_semantics<parallel>], iteration_bounds = array<i64: 4>, scalar_prefetch = 0 : i64, scratch_operands = 0 : i64, tpu.core_type = #tpu.core_type<tc>, window_params = [{transform_indices = @transform_0, window_bounds = array<i64: 8, 256>}, {pipeline_mode = #tpu.pipeline_mode<synchronous>, transform_indices = @transform_1, window_bounds = array<i64: 8, 1>}, {pipeline_mode = #tpu.pipeline_mode<synchronous>, transform_indices = @transform_2, window_bounds = array<i64: 8, 1>}, {transform_indices = @transform_3, window_bounds = array<i64: 4, 256>}, {pipeline_mode = #tpu.pipeline_mode<synchronous>, transform_indices = @transform_4, window_bounds = array<i64: 8, 4>}, {pipeline_mode = #tpu.pipeline_mode<synchronous>, transform_indices = @transform_5, window_bounds = array<i64: 8, 1>}, {transform_indices = @transform_6, window_bounds = array<i64: 8, 256>}]} {
    %c0 = arith.constant 0 : index
    %c0_0 = arith.constant 0 : index
    %0 = vector.load %arg5[%c0, %c0_0] : memref<8x4xf32, #tpu.memory_space<vmem>>, vector<8x4xf32>
    %c0_1 = arith.constant 0 : index
    %c0_2 = arith.constant 0 : index
    %1 = vector.load %arg4[%c0_1, %c0_2] : memref<4x256xf32, #tpu.memory_space<vmem>>, vector<4x256xf32>
    %cst = arith.constant dense<0.000000e+00> : vector<8x256xf32>
    %2 = tpu.matmul %0, %1, %cst {dimension_numbers = #tpu.dot_dimension_numbers<[1], [0], [0], [1], [0, 0, 1, 1], [], []>} : vector<8x4xf32>, vector<4x256xf32>, vector<8x256xf32> -> vector<8x256xf32>
    %c0_3 = arith.constant 0 : index
    %c0_4 = arith.constant 0 : index
    %3 = vector.load %arg6[%c0_3, %c0_4] : memref<8x1xf32, #tpu.memory_space<vmem>>, vector<8x1xf32>
    %4 = vector.broadcast %3 : vector<8x1xf32> to vector<8x256xf32>
    %5 = arith.addf %2, %4 : vector<8x256xf32>
    %c0_5 = arith.constant 0 : index
    %c0_6 = arith.constant 0 : index
    %6 = vector.load %arg1[%c0_5, %c0_6] : memref<8x256xbf16, #tpu.memory_space<vmem>>, vector<8x256xbf16>
    %7 = arith.extf %6 : vector<8x256xbf16> to vector<8x256xf32>
    %c0_7 = arith.constant 0 : index
    %c0_8 = arith.constant 0 : index
    %8 = vector.load %arg2[%c0_7, %c0_8] : memref<8x1xf32, #tpu.memory_space<vmem>>, vector<8x1xf32>
    %9 = vector.broadcast %8 : vector<8x1xf32> to vector<8x256xf32>
    %10 = arith.mulf %7, %9 : vector<8x256xf32>
    %c0_9 = arith.constant 0 : index
    %c0_10 = arith.constant 0 : index
    %11 = vector.load %arg3[%c0_9, %c0_10] : memref<8x1xf32, #tpu.memory_space<vmem>>, vector<8x1xf32>
    %12 = vector.broadcast %11 : vector<8x1xf32> to vector<8x256xf32>
    %13 = arith.addf %10, %12 : vector<8x256xf32>
    %cst_11 = arith.constant 5.000000e-01 : f32
    %14 = vector.broadcast %cst_11 : f32 to vector<8x256xf32>
    %15 = arith.mulf %14, %13 : vector<8x256xf32>
    %cst_12 = arith.constant 4.471500e-02 : f32
    %16 = vector.broadcast %cst_12 : f32 to vector<8x256xf32>
    %17 = arith.mulf %16, %13 : vector<8x256xf32>
    %18 = arith.mulf %17, %13 : vector<8x256xf32>
    %19 = arith.mulf %18, %13 : vector<8x256xf32>
    %20 = arith.addf %13, %19 : vector<8x256xf32>
    %cst_13 = arith.constant 0.797884583 : f32
    %21 = vector.broadcast %cst_13 : f32 to vector<8x256xf32>
    %22 = arith.mulf %21, %20 : vector<8x256xf32>
    %23 = math.tanh %22 : vector<8x256xf32>
    %cst_14 = arith.constant 1.000000e+00 : f32
    %24 = vector.broadcast %cst_14 : f32 to vector<8x256xf32>
    %25 = arith.addf %24, %23 : vector<8x256xf32>
    %26 = arith.mulf %15, %25 : vector<8x256xf32>
    %27 = arith.addf %5, %26 : vector<8x256xf32>
    %c0_15 = arith.constant 0 : index
    %c0_16 = arith.constant 0 : index
    %28 = vector.load %arg7[%c0_15, %c0_16] : memref<8x256xf32, #tpu.memory_space<vmem>>, vector<8x256xf32>
    tpu.vector_store %arg7[%c0_15, %c0_16], %27 {strides = array<i32>} : memref<8x256xf32, #tpu.memory_space<vmem>>, vector<8x256xf32>,
    return
  }
  func.func @transform_0(%arg0: i32) -> (i32, i32) {
    %c1_i32 = arith.constant 1 : i32
    %0 = arith.addi %c1_i32, %arg0 : i32
    %c0_i32 = arith.constant 0 : i32
    %c0_i32_0 = arith.constant 0 : i32
    return %c0_i32, %0 : i32, i32
  }
  func.func @transform_1(%arg0: i32) -> (i32, i32) {
    %c0_i32 = arith.constant 0 : i32
    %c0_i32_0 = arith.constant 0 : i32
    %c0_i32_1 = arith.constant 0 : i32
    return %c0_i32, %c0_i32_0 : i32, i32
  }
  func.func @transform_2(%arg0: i32) -> (i32, i32) {
    %c0_i32 = arith.constant 0 : i32
    %c0_i32_0 = arith.constant 0 : i32
    %c0_i32_1 = arith.constant 0 : i32
    return %c0_i32, %c0_i32_0 : i32, i32
  }
  func.func @transform_3(%arg0: i32) -> (i32, i32) {
    %c1_i32 = arith.constant 1 : i32
    %0 = arith.addi %c1_i32, %arg0 : i32
    %c0_i32 = arith.constant 0 : i32
    %c0_i32_0 = arith.constant 0 : i32
    return %c0_i32, %0 : i32, i32
  }
  func.func @transform_4(%arg0: i32) -> (i32, i32) {
    %c0_i32 = arith.constant 0 : i32
    %c0_i32_0 = arith.constant 0 : i32
    %c0_i32_1 = arith.constant 0 : i32
    return %c0_i32, %c0_i32_0 : i32, i32
  }
  func.func @transform_5(%arg0: i32) -> (i32, i32) {
    %c0_i32 = arith.constant 0 : i32
    %c0_i32_0 = arith.constant 0 : i32
    %c0_i32_1 = arith.constant 0 : i32
    return %c0_i32, %c0_i32_0 : i32, i32
  }
  func.func @transform_6(%arg0: i32) -> (i32, i32) {
    %c0_i32 = arith.constant 0 : i32
    %c0_i32_0 = arith.constant 0 : i32
    return %c0_i32, %arg0 : i32, i32
  }
}

module attributes {stable_mosaic.version = 11 : i64} {
  func.func @_conv_stats_kernel(%arg0: i32, %arg1: i32, %arg2: memref<8x128xbf16, #tpu.memory_space<vmem>>, %arg3: memref<8x256xbf16, #tpu.memory_space<vmem>>, %arg4: memref<8x128xbf16, #tpu.memory_space<vmem>>, %arg5: memref<1x128xf32, #tpu.memory_space<vmem>>, %arg6: memref<1x256xf32, #tpu.memory_space<vmem>>, %arg7: memref<1x128xf32, #tpu.memory_space<vmem>>, %arg8: memref<8x200xbf16, #tpu.memory_space<vmem>>, %arg9: memref<8x1xf32, #tpu.memory_space<vmem>>, %arg10: memref<8x1xf32, #tpu.memory_space<vmem>>, %arg11: memref<8x256xbf16, #tpu.memory_space<vmem>>, %arg12: memref<8x1xf32, #tpu.memory_space<vmem>>, %arg13: memref<8x1xf32, #tpu.memory_space<vmem>>) attributes {dimension_semantics = [#tpu.dimension_semantics<parallel>, #tpu.dimension_semantics<arbitrary>], iteration_bounds = array<i64: 2, 2>, scalar_prefetch = 0 : i64, scratch_operands = 0 : i64, tpu.core_type = #tpu.core_type<tc>, window_params = [{transform_indices = @transform_0, window_bounds = array<i64: 8, 128>}, {transform_indices = @transform_1, window_bounds = array<i64: 8, 256>}, {transform_indices = @transform_2, window_bounds = array<i64: 8, 128>}, {transform_indices = @transform_3, window_bounds = array<i64: 1, 128>}, {transform_indices = @transform_4, window_bounds = array<i64: 1, 256>}, {transform_indices = @transform_5, window_bounds = array<i64: 1, 128>}, {pipeline_mode = #tpu.pipeline_mode<synchronous>, transform_indices = @transform_6, window_bounds = array<i64: 8, 200>}, {pipeline_mode = #tpu.pipeline_mode<synchronous>, transform_indices = @transform_7, window_bounds = array<i64: 8, 1>}, {pipeline_mode = #tpu.pipeline_mode<synchronous>, transform_indices = @transform_8, window_bounds = array<i64: 8, 1>}, {transform_indices = @transform_9, window_bounds = array<i64: 8, 256>}, {transform_indices = @transform_10, window_bounds = array<i64: 8, 1>}, {transform_indices = @transform_11, window_bounds = array<i64: 8, 1>}]} {
    %c0 = arith.constant 0 : index
    %c0_0 = arith.constant 0 : index
    %0 = vector.load %arg2[%c0, %c0_0] : memref<8x128xbf16, #tpu.memory_space<vmem>>, vector<8x128xbf16>
    %c0_1 = arith.constant 0 : index
    %c0_2 = arith.constant 0 : index
    %1 = vector.load %arg3[%c0_1, %c0_2] : memref<8x256xbf16, #tpu.memory_space<vmem>>, vector<8x256xbf16>
    %c0_3 = arith.constant 0 : index
    %c0_4 = arith.constant 0 : index
    %2 = vector.load %arg4[%c0_3, %c0_4] : memref<8x128xbf16, #tpu.memory_space<vmem>>, vector<8x128xbf16>
    %3 = tpu.concatenate %0, %1, %2 in 1 : vector<8x128xbf16>, vector<8x256xbf16>, vector<8x128xbf16> -> vector<8x512xbf16>
    %c0_5 = arith.constant 0 : index
    %c0_6 = arith.constant 0 : index
    %4 = vector.load %arg5[%c0_5, %c0_6] : memref<1x128xf32, #tpu.memory_space<vmem>>, vector<1x128xf32>
    %c0_7 = arith.constant 0 : index
    %c0_8 = arith.constant 0 : index
    %5 = vector.load %arg6[%c0_7, %c0_8] : memref<1x256xf32, #tpu.memory_space<vmem>>, vector<1x256xf32>
    %c0_9 = arith.constant 0 : index
    %c0_10 = arith.constant 0 : index
    %6 = vector.load %arg7[%c0_9, %c0_10] : memref<1x128xf32, #tpu.memory_space<vmem>>, vector<1x128xf32>
    %7 = tpu.concatenate %4, %5, %6 in 1 : vector<1x128xf32>, vector<1x256xf32>, vector<1x128xf32> -> vector<1x512xf32>
    %8 = arith.extf %3 : vector<8x512xbf16> to vector<8x512xf32>
    %c0_11 = arith.constant 0 : index
    %c0_12 = arith.constant 0 : index
    %9 = vector.load %arg9[%c0_11, %c0_12] : memref<8x1xf32, #tpu.memory_space<vmem>>, vector<8x1xf32>
    %10 = vector.broadcast %9 : vector<8x1xf32> to vector<8x512xf32>
    %11 = arith.mulf %8, %10 : vector<8x512xf32>
    %c0_13 = arith.constant 0 : index
    %c0_14 = arith.constant 0 : index
    %12 = vector.load %arg10[%c0_13, %c0_14] : memref<8x1xf32, #tpu.memory_space<vmem>>, vector<8x1xf32>
    %13 = vector.broadcast %12 : vector<8x1xf32> to vector<8x512xf32>
    %14 = arith.addf %11, %13 : vector<8x512xf32>
    %cst = arith.constant 5.000000e-01 : f32
    %15 = vector.broadcast %cst : f32 to vector<8x512xf32>
    %16 = arith.mulf %15, %14 : vector<8x512xf32>
    %cst_15 = arith.constant 4.471500e-02 : f32
    %17 = vector.broadcast %cst_15 : f32 to vector<8x512xf32>
    %18 = arith.mulf %17, %14 : vector<8x512xf32>
    %19 = arith.mulf %18, %14 : vector<8x512xf32>
    %20 = arith.mulf %19, %14 : vector<8x512xf32>
    %21 = arith.addf %14, %20 : vector<8x512xf32>
    %cst_16 = arith.constant 0.797884583 : f32
    %22 = vector.broadcast %cst_16 : f32 to vector<8x512xf32>
    %23 = arith.mulf %22, %21 : vector<8x512xf32>
    %24 = math.tanh %23 : vector<8x512xf32>
    %cst_17 = arith.constant 1.000000e+00 : f32
    %25 = vector.broadcast %cst_17 : f32 to vector<8x512xf32>
    %26 = arith.addf %25, %24 : vector<8x512xf32>
    %27 = arith.mulf %16, %26 : vector<8x512xf32>
    %cst_18 = arith.constant 5.000000e-01 : f32
    %28 = vector.broadcast %cst_18 : f32 to vector<1x512xf32>
    %29 = arith.cmpf ogt, %7, %28 : vector<1x512xf32>
    %cst_19 = arith.constant 0.000000e+00 : f32
    %30 = vector.shape_cast %29 : vector<1x512xi1> to vector<1x512xi1>
    %31 = vector.broadcast %30 : vector<1x512xi1> to vector<8x512xi1>
    %32 = vector.broadcast %cst_19 : f32 to vector<8x512xf32>
    %33 = arith.select %31, %27, %32 : vector<8x512xi1>, vector<8x512xf32>
    %34 = arith.truncf %33 : vector<8x512xf32> to vector<8x512xbf16>
    %35 = vector.extract_strided_slice %34 {offsets = [0, 86], sizes = [8, 256], strides = [1, 1]} : vector<8x512xbf16> to vector<8x256xbf16>
    %36 = vector.extract_strided_slice %34 {offsets = [0, 87], sizes = [8, 256], strides = [1, 1]} : vector<8x512xbf16> to vector<8x256xbf16>
    %37 = vector.extract_strided_slice %34 {offsets = [0, 88], sizes = [8, 256], strides = [1, 1]} : vector<8x512xbf16> to vector<8x256xbf16>
    %38 = vector.extract_strided_slice %34 {offsets = [0, 89], sizes = [8, 256], strides = [1, 1]} : vector<8x512xbf16> to vector<8x256xbf16>
    %39 = vector.extract_strided_slice %34 {offsets = [0, 90], sizes = [8, 256], strides = [1, 1]} : vector<8x512xbf16> to vector<8x256xbf16>
    %40 = vector.extract_strided_slice %34 {offsets = [0, 106], sizes = [8, 256], strides = [1, 1]} : vector<8x512xbf16> to vector<8x256xbf16>
    %41 = vector.extract_strided_slice %34 {offsets = [0, 107], sizes = [8, 256], strides = [1, 1]} : vector<8x512xbf16> to vector<8x256xbf16>
    %42 = vector.extract_strided_slice %34 {offsets = [0, 108], sizes = [8, 256], strides = [1, 1]} : vector<8x512xbf16> to vector<8x256xbf16>
    %43 = vector.extract_strided_slice %34 {offsets = [0, 109], sizes = [8, 256], strides = [1, 1]} : vector<8x512xbf16> to vector<8x256xbf16>
    %44 = vector.extract_strided_slice %34 {offsets = [0, 110], sizes = [8, 256], strides = [1, 1]} : vector<8x512xbf16> to vector<8x256xbf16>
    %45 = vector.extract_strided_slice %34 {offsets = [0, 126], sizes = [8, 256], strides = [1, 1]} : vector<8x512xbf16> to vector<8x256xbf16>
    %46 = vector.extract_strided_slice %34 {offsets = [0, 127], sizes = [8, 256], strides = [1, 1]} : vector<8x512xbf16> to vector<8x256xbf16>
    %47 = vector.extract_strided_slice %34 {offsets = [0, 128], sizes = [8, 256], strides = [1, 1]} : vector<8x512xbf16> to vector<8x256xbf16>
    %48 = vector.extract_strided_slice %34 {offsets = [0, 129], sizes = [8, 256], strides = [1, 1]} : vector<8x512xbf16> to vector<8x256xbf16>
    %49 = vector.extract_strided_slice %34 {offsets = [0, 130], sizes = [8, 256], strides = [1, 1]} : vector<8x512xbf16> to vector<8x256xbf16>
    %50 = vector.extract_strided_slice %34 {offsets = [0, 146], sizes = [8, 256], strides = [1, 1]} : vector<8x512xbf16> to vector<8x256xbf16>
    %51 = vector.extract_strided_slice %34 {offsets = [0, 147], sizes = [8, 256], strides = [1, 1]} : vector<8x512xbf16> to vector<8x256xbf16>
    %52 = vector.extract_strided_slice %34 {offsets = [0, 148], sizes = [8, 256], strides = [1, 1]} : vector<8x512xbf16> to vector<8x256xbf16>
    %53 = vector.extract_strided_slice %34 {offsets = [0, 149], sizes = [8, 256], strides = [1, 1]} : vector<8x512xbf16> to vector<8x256xbf16>
    %54 = vector.extract_strided_slice %34 {offsets = [0, 150], sizes = [8, 256], strides = [1, 1]} : vector<8x512xbf16> to vector<8x256xbf16>
    %55 = vector.extract_strided_slice %34 {offsets = [0, 166], sizes = [8, 256], strides = [1, 1]} : vector<8x512xbf16> to vector<8x256xbf16>
    %56 = vector.extract_strided_slice %34 {offsets = [0, 167], sizes = [8, 256], strides = [1, 1]} : vector<8x512xbf16> to vector<8x256xbf16>
    %57 = vector.extract_strided_slice %34 {offsets = [0, 168], sizes = [8, 256], strides = [1, 1]} : vector<8x512xbf16> to vector<8x256xbf16>
    %58 = vector.extract_strided_slice %34 {offsets = [0, 169], sizes = [8, 256], strides = [1, 1]} : vector<8x512xbf16> to vector<8x256xbf16>
    %59 = vector.extract_strided_slice %34 {offsets = [0, 170], sizes = [8, 256], strides = [1, 1]} : vector<8x512xbf16> to vector<8x256xbf16>
    %60 = tpu.concatenate %35, %36, %37, %38, %39, %40, %41, %42, %43, %44, %45, %46, %47, %48, %49, %50 in 0 : vector<8x256xbf16>, vector<8x256xbf16>, vector<8x256xbf16>, vector<8x256xbf16>, vector<8x256xbf16>, vector<8x256xbf16>, vector<8x256xbf16>, vector<8x256xbf16>, vector<8x256xbf16>, vector<8x256xbf16>, vector<8x256xbf16>, vector<8x256xbf16>, vector<8x256xbf16>, vector<8x256xbf16>, vector<8x256xbf16>, vector<8x256xbf16> -> vector<128x256xbf16>
    %61 = tpu.concatenate %51, %52, %53, %54, %55, %56, %57, %58, %59 in 0 : vector<8x256xbf16>, vector<8x256xbf16>, vector<8x256xbf16>, vector<8x256xbf16>, vector<8x256xbf16>, vector<8x256xbf16>, vector<8x256xbf16>, vector<8x256xbf16>, vector<8x256xbf16> -> vector<72x256xbf16>
    %62 = tpu.concatenate %60, %61 in 0 : vector<128x256xbf16>, vector<72x256xbf16> -> vector<200x256xbf16>
    %c0_20 = arith.constant 0 : index
    %c0_21 = arith.constant 0 : index
    %63 = vector.load %arg8[%c0_20, %c0_21] : memref<8x200xbf16, #tpu.memory_space<vmem>>, vector<8x200xbf16>
    %cst_22 = arith.constant dense<0.000000e+00> : vector<8x256xf32>
    %64 = tpu.matmul %63, %62, %cst_22 {dimension_numbers = #tpu.dot_dimension_numbers<[1], [0], [0], [1], [0, 0, 1, 1], [], []>} : vector<8x200xbf16>, vector<200x256xbf16>, vector<8x256xf32> -> vector<8x256xf32>
    %c0_23 = arith.constant 0 : index
    %c0_24 = arith.constant 0 : index
    %65 = vector.load %arg6[%c0_23, %c0_24] : memref<1x256xf32, #tpu.memory_space<vmem>>, vector<1x256xf32>
    %66 = vector.broadcast %65 : vector<1x256xf32> to vector<8x256xf32>
    %67 = arith.mulf %64, %66 : vector<8x256xf32>
    %68 = arith.truncf %67 : vector<8x256xf32> to vector<8x256xbf16>
    %c0_25 = arith.constant 0 : index
    %c0_26 = arith.constant 0 : index
    %69 = vector.load %arg11[%c0_25, %c0_26] : memref<8x256xbf16, #tpu.memory_space<vmem>>, vector<8x256xbf16>
    tpu.vector_store %arg11[%c0_25, %c0_26], %68 {strides = array<i32>} : memref<8x256xbf16, #tpu.memory_space<vmem>>, vector<8x256xbf16>,
    %c0_i32 = arith.constant 0 : i32
    %70 = arith.cmpi eq, %arg1, %c0_i32 : i32
    %71 = arith.extui %70 : i1 to i32
    %c0_i32_27 = arith.constant 0 : i32
    %72 = arith.cmpi ne, %71, %c0_i32_27 : i32
    scf.if %72 {
      %cst_38 = arith.constant 0.000000e+00 : f32
      %84 = vector.broadcast %cst_38 : f32 to vector<8x1xf32>
      %c0_39 = arith.constant 0 : index
      %c0_40 = arith.constant 0 : index
      %85 = vector.load %arg12[%c0_39, %c0_40] : memref<8x1xf32, #tpu.memory_space<vmem>>, vector<8x1xf32>
      tpu.vector_store %arg12[%c0_39, %c0_40], %84 {strides = array<i32>} : memref<8x1xf32, #tpu.memory_space<vmem>>, vector<8x1xf32>,
      %cst_41 = arith.constant 0.000000e+00 : f32
      %86 = vector.broadcast %cst_41 : f32 to vector<8x1xf32>
      %c0_42 = arith.constant 0 : index
      %c0_43 = arith.constant 0 : index
      %87 = vector.load %arg13[%c0_42, %c0_43] : memref<8x1xf32, #tpu.memory_space<vmem>>, vector<8x1xf32>
      tpu.vector_store %arg13[%c0_42, %c0_43], %86 {strides = array<i32>} : memref<8x1xf32, #tpu.memory_space<vmem>>, vector<8x1xf32>,
    } else {
    }
    %c0_28 = arith.constant 0 : index
    %c0_29 = arith.constant 0 : index
    %73 = vector.load %arg12[%c0_28, %c0_29] : memref<8x1xf32, #tpu.memory_space<vmem>>, vector<8x1xf32>
    %cst_30 = arith.constant dense<0.000000e+00> : vector<8xf32>
    %74 = vector.multi_reduction <add>, %67, %cst_30 [1] : vector<8x256xf32> to vector<8xf32>
    %75 = vector.shape_cast %74 : vector<8xf32> to vector<8x1xf32>
    %76 = arith.addf %73, %75 : vector<8x1xf32>
    %c0_31 = arith.constant 0 : index
    %c0_32 = arith.constant 0 : index
    %77 = vector.load %arg12[%c0_31, %c0_32] : memref<8x1xf32, #tpu.memory_space<vmem>>, vector<8x1xf32>
    tpu.vector_store %arg12[%c0_31, %c0_32], %76 {strides = array<i32>} : memref<8x1xf32, #tpu.memory_space<vmem>>, vector<8x1xf32>,
    %c0_33 = arith.constant 0 : index
    %c0_34 = arith.constant 0 : index
    %78 = vector.load %arg13[%c0_33, %c0_34] : memref<8x1xf32, #tpu.memory_space<vmem>>, vector<8x1xf32>
    %79 = arith.mulf %67, %67 : vector<8x256xf32>
    %cst_35 = arith.constant dense<0.000000e+00> : vector<8xf32>
    %80 = vector.multi_reduction <add>, %79, %cst_35 [1] : vector<8x256xf32> to vector<8xf32>
    %81 = vector.shape_cast %80 : vector<8xf32> to vector<8x1xf32>
    %82 = arith.addf %78, %81 : vector<8x1xf32>
    %c0_36 = arith.constant 0 : index
    %c0_37 = arith.constant 0 : index
    %83 = vector.load %arg13[%c0_36, %c0_37] : memref<8x1xf32, #tpu.memory_space<vmem>>, vector<8x1xf32>
    tpu.vector_store %arg13[%c0_36, %c0_37], %82 {strides = array<i32>} : memref<8x1xf32, #tpu.memory_space<vmem>>, vector<8x1xf32>,
    return
  }
  func.func @transform_0(%arg0: i32, %arg1: i32) -> (i32, i32) {
    %c2_i32 = arith.constant 2 : i32
    %0 = arith.muli %arg0, %c2_i32 : i32
    %1 = arith.addi %0, %arg1 : i32
    %c1_i32 = arith.constant 1 : i32
    %2 = arith.addi %c1_i32, %1 : i32
    %c2_i32_0 = arith.constant 2 : i32
    %3 = arith.muli %2, %c2_i32_0 : i32
    %c1_i32_1 = arith.constant 1 : i32
    %4 = arith.subi %3, %c1_i32_1 : i32
    %c0_i32 = arith.constant 0 : i32
    %c0_i32_2 = arith.constant 0 : i32
    return %c0_i32, %4 : i32, i32
  }
  func.func @transform_1(%arg0: i32, %arg1: i32) -> (i32, i32) {
    %c2_i32 = arith.constant 2 : i32
    %0 = arith.muli %arg0, %c2_i32 : i32
    %1 = arith.addi %0, %arg1 : i32
    %c1_i32 = arith.constant 1 : i32
    %2 = arith.addi %c1_i32, %1 : i32
    %c0_i32 = arith.constant 0 : i32
    %c0_i32_0 = arith.constant 0 : i32
    return %c0_i32, %2 : i32, i32
  }
  func.func @transform_2(%arg0: i32, %arg1: i32) -> (i32, i32) {
    %c2_i32 = arith.constant 2 : i32
    %0 = arith.muli %arg0, %c2_i32 : i32
    %1 = arith.addi %0, %arg1 : i32
    %c2_i32_0 = arith.constant 2 : i32
    %2 = arith.addi %c2_i32_0, %1 : i32
    %c2_i32_1 = arith.constant 2 : i32
    %3 = arith.muli %2, %c2_i32_1 : i32
    %c0_i32 = arith.constant 0 : i32
    %c0_i32_2 = arith.constant 0 : i32
    return %c0_i32, %3 : i32, i32
  }
  func.func @transform_3(%arg0: i32, %arg1: i32) -> (i32, i32) {
    %c2_i32 = arith.constant 2 : i32
    %0 = arith.muli %arg0, %c2_i32 : i32
    %1 = arith.addi %0, %arg1 : i32
    %c1_i32 = arith.constant 1 : i32
    %2 = arith.addi %c1_i32, %1 : i32
    %c2_i32_0 = arith.constant 2 : i32
    %3 = arith.muli %2, %c2_i32_0 : i32
    %c1_i32_1 = arith.constant 1 : i32
    %4 = arith.subi %3, %c1_i32_1 : i32
    %c0_i32 = arith.constant 0 : i32
    %c0_i32_2 = arith.constant 0 : i32
    return %c0_i32, %4 : i32, i32
  }
  func.func @transform_4(%arg0: i32, %arg1: i32) -> (i32, i32) {
    %c2_i32 = arith.constant 2 : i32
    %0 = arith.muli %arg0, %c2_i32 : i32
    %1 = arith.addi %0, %arg1 : i32
    %c1_i32 = arith.constant 1 : i32
    %2 = arith.addi %c1_i32, %1 : i32
    %c0_i32 = arith.constant 0 : i32
    %c0_i32_0 = arith.constant 0 : i32
    return %c0_i32, %2 : i32, i32
  }
  func.func @transform_5(%arg0: i32, %arg1: i32) -> (i32, i32) {
    %c2_i32 = arith.constant 2 : i32
    %0 = arith.muli %arg0, %c2_i32 : i32
    %1 = arith.addi %0, %arg1 : i32
    %c2_i32_0 = arith.constant 2 : i32
    %2 = arith.addi %c2_i32_0, %1 : i32
    %c2_i32_1 = arith.constant 2 : i32
    %3 = arith.muli %2, %c2_i32_1 : i32
    %c0_i32 = arith.constant 0 : i32
    %c0_i32_2 = arith.constant 0 : i32
    return %c0_i32, %3 : i32, i32
  }
  func.func @transform_6(%arg0: i32, %arg1: i32) -> (i32, i32) {
    %c0_i32 = arith.constant 0 : i32
    %c0_i32_0 = arith.constant 0 : i32
    %c0_i32_1 = arith.constant 0 : i32
    return %c0_i32, %c0_i32_0 : i32, i32
  }
  func.func @transform_7(%arg0: i32, %arg1: i32) -> (i32, i32) {
    %c0_i32 = arith.constant 0 : i32
    %c0_i32_0 = arith.constant 0 : i32
    %c0_i32_1 = arith.constant 0 : i32
    return %c0_i32, %c0_i32_0 : i32, i32
  }
  func.func @transform_8(%arg0: i32, %arg1: i32) -> (i32, i32) {
    %c0_i32 = arith.constant 0 : i32
    %c0_i32_0 = arith.constant 0 : i32
    %c0_i32_1 = arith.constant 0 : i32
    return %c0_i32, %c0_i32_0 : i32, i32
  }
  func.func @transform_9(%arg0: i32, %arg1: i32) -> (i32, i32) {
    %c2_i32 = arith.constant 2 : i32
    %0 = arith.muli %arg0, %c2_i32 : i32
    %1 = arith.addi %0, %arg1 : i32
    %c1_i32 = arith.constant 1 : i32
    %2 = arith.addi %c1_i32, %1 : i32
    %c0_i32 = arith.constant 0 : i32
    %c0_i32_0 = arith.constant 0 : i32
    return %c0_i32, %2 : i32, i32
  }
  func.func @transform_10(%arg0: i32, %arg1: i32) -> (i32, i32) {
    %c0_i32 = arith.constant 0 : i32
    %c0_i32_0 = arith.constant 0 : i32
    return %arg0, %c0_i32 : i32, i32
  }
  func.func @transform_11(%arg0: i32, %arg1: i32) -> (i32, i32) {
    %c0_i32 = arith.constant 0 : i32
    %c0_i32_0 = arith.constant 0 : i32
    return %arg0, %c0_i32 : i32, i32
  }
}

</mosaic_0001>

<bundles_post_ra>
// kernel: residual_block_forward.5
= control target key start
LH: loop header
LB: loop body
LE: loop exit
PB: predicated region body
PF: predicated region fallthrough
CT: control target
= control target key end

     0   :  { %s572_s21 = smov 0   ;;  %s609_s0 = inlined_call_operand.vmem [shape: bf16[8,1536], index: 0, kind: input, shape index: {}]   ;;  %s610_s1 = inlined_call_operand.vmem [shape: f32[8,1], index: 1, kind: input, shape index: {}]   ;;  %s611_s2 = inlined_call_operand.vmem [shape: f32[8,1], index: 2, kind: input, shape index: {}]   ;;  %s612_s3 = inlined_call_operand.vmem [shape: f32[4,1536], index: 3, kind: input, shape index: {}]   ;;  %s613_s4 = inlined_call_operand.vmem [shape: f32[8,4], index: 4, kind: input, shape index: {}]   ;;  %s614_s5 = inlined_call_operand.vmem [shape: f32[8,1], index: 5, kind: input, shape index: {}]   ;;  %s615_s6 = inlined_call_operand.vmem [shape: f32[8,1024], index: 6, kind: output, shape index: {}]  }
   0x1 LB: > { %s490_s22 = sadd.s32 4294967295, %s533_s21   ;;  %p494_p0 = scmp.ge.s32.totalorder %s533_s21, 1  ;;  %s533_s21 = sphi %s572_s21, %s16_s21  }
   0x2   : > { %p232_p1 = scmp.lt.s32.totalorder %s533_s21, 5 }
   0x4   : > { %p233_p2 = pnand %p494_p0, %p232_p1 }
   0x5   : > { %s580_s23 = sshll.u32 (!%p233_p2), %s490_s22, 1 }
   0x6   : > { %236 = sbr.rel (%p233_p2) target bundleno = 219 (0xdb), region = 44  ;;  %s507_s24 = sadd.s32 (!%p233_p2), 2, %s580_s23 }
   0x7   : > { %p271_p3 = scmp.lt.s32.totalorder (!%p233_p2), %s507_s24, 11  ;;  %p286_p4 = scmp.lt.s32.totalorder (!%p233_p2), %s580_s23, 7 }
   0xb   : > { %v535_v0 = vmov 0.0   ;;  %v536_v1 = vmov 0   ;;  %v384_v2 = vld [vmem:[%s610_s1] sm:$0xff]  ;;  %s617_s24 = smov (!%p271_p3, %s507_s24), 11  ;;  %vm305_vm0 = vcmask 1043456   ;;  %vm301_vm1 = vcmask 31744  }
   0xc   : > { %374 = vmatprep.mubr.f32.mxu0 %v535_v0  ;;  %520 = vset.pattern.permute.xlu0 %v536_v1  ;;  %v293_v3 = vld [vmem:[%s614_s5] sm:$0xff]  ;;  %s496_s7 = sshll.u32 %s617_s24, 2  ;;  %s619_s23 = smov (!%p286_p4, %s580_s23), 7 }
   0xd   : > { %387 = vperm.xlu0 %520, %v384_v2   ;;  %521 = vset.pattern.permute.xlu1 %v536_v1  ;;  %v392_v4 = vld [vmem:[%s611_s2] sm:$0xff]  ;;  %s282_s10 = scalar_lea.vmem %s612_s3, %s496_s7  ;;  %s274_s15 = scalar_lea.vmem %s609_s0, %s496_s7 }
   0xe   : > { %296 = vperm.xlu1 %521, %v293_v3   ;;  %v292_v5 = vld [vmem:[%s282_s10] sm:$0xff]  ;;  %s500_s16 = sshll.u32 %s619_s23, 3 }
   0xf   : > { %v300_v6 = vcombine.high %v292_v5, %v292_v5  ;;  %v291_v7 = vld [vmem:[%s613_s4] sm:$0xff]  ;;  %s289_s19 = scalar_lea.vmem %s615_s6, %s500_s16 }
  0x10   : > { %v381_v8 = vld [vmem:[%s274_s15] sm:$0xff] }
  0x11   : > { %395 = vperm.xlu0 %520, %v392_v4   ;;  %501 = vmatprep.subr.msk.mxu0 %vm305_vm0, %v300_v6  ;;  %v382_v10 = vunpack.c.l.bf16 %v381_v8  ;;  %v383_v11 = vunpack.c.h.bf16 %v381_v8 }
  0x12   : > { %502 = vmatpush1.msk.msra.mxu0 %vm305_vm0, %v292_v5 }
  0x13   : > { %503 = vmatmul.mubr.msk.f32.vlgmr.msra.gmra.mxu0 %vm301_vm1, %v291_v7 }
  0x88   : > { %v388_v9 = vpop.permute.xlu0 %387 }
  0x89   : > { %v390_v12 = vmul.f32 %v388_v9, %v382_v10  ;;  %v391_v14 = vmul.f32 %v388_v9, %v383_v11  ;;  %v297_v31 = vpop.permute.xlu1 %296 }
  0x8c   : > { %v396_v13 = vpop.permute.xlu0 %395 }
  0x8d   : > { %v398_v15 = vadd.f32 %v396_v13, %v390_v12  ;;  %v399_v16 = vadd.f32 %v396_v13, %v391_v14 }
  0x8f   : > { %v402_v17 = vmul.f32 0.044715, %v398_v15  ;;  %v403_v18 = vmul.f32 0.044715, %v399_v16  ;;  %v400_v29 = vmul.f32 0.5, %v398_v15  ;;  %v401_v32 = vmul.f32 0.5, %v399_v16 }
  0x91   : > { %v404_v19 = vmul.f32 %v402_v17, %v398_v15  ;;  %v405_v20 = vmul.f32 %v403_v18, %v399_v16 }
  0x93   : > { %v406_v21 = vmul.f32 %v404_v19, %v398_v15  ;;  %v407_v22 = vmul.f32 %v405_v20, %v399_v16 }
  0x95   : > { %v408_v23 = vadd.f32 %v406_v21, %v398_v15  ;;  %v409_v24 = vadd.f32 %v407_v22, %v399_v16 }
  0x97   : > { %v410_v25 = vmul.f32 0.7978846, %v408_v23  ;;  %v411_v26 = vmul.f32 0.7978846, %v409_v24 }
  0x99   : > { %523 = vtanh.f32 %v410_v25 }
  0x9a   : > { %525 = vtanh.f32 %v411_v26 }
  0xa6   : > { %v524_v27 = vpop.eup %523 }
  0xa7   : > { %v526_v28 = vpop.eup %525  ;;  %v414_v30 = vadd.f32 1.0, %v524_v27 }
  0xa8   : > { %v415_v33 = vadd.f32 1.0, %v526_v28 }
  0xa9   : > { %v416_v36 = vmul.f32 %v414_v30, %v400_v29 }
  0xaa   : > { %v417_v40 = vmul.f32 %v415_v33, %v401_v32 }
  0xd3   : > { %v376_v34 = vpop.f32.mrf.mxu0 }
  0xd4   : > { %v377_v35 = vadd.f32 %v376_v34, %v297_v31 }
  0xd5   : > { %v378_v37 = vpop.f32.mrf.mxu0 }
  0xd6   : > { %v418_v38 = vadd.f32 %v416_v36, %v377_v35  ;;  %v379_v39 = vadd.f32 %v378_v37, %v297_v31 }
  0xd8   : > { %420 = vst [vmem:[%s289_s19] sm:$0xff] %v418_v38  ;;  %v419_v41 = vadd.f32 %v417_v40, %v379_v39 }
  0xda   : > { %421 = vst [vmem:[%s289_s19 + $0x8] sm:$0xff] %v419_v41 }
  0xdb PF: > { %s16_s21 = sadd.s32 1, %s533_s21  }
  0xdc   : > { %p13_p5 = scmp.ge.s32.totalorder %s16_s21, 6  }
  0xde   :  { %15 = sbr.rel (!%p13_p5) target bundleno = 1 (0x1), region = 77 }

// kernel: residual_block_forward.3
= control target key start
LH: loop header
LB: loop body
LE: loop exit
PB: predicated region body
PF: predicated region fallthrough
CT: control target
= control target key end

     0   :  { %s1399_s24 = smov 0   ;;  %s1401_s25 = smov 0   ;;  %s1786_s0 = inlined_call_operand.vmem [shape: f32[4,1536], index: 0, kind: input, shape index: {}, may-alias: {0,1,2}]   ;;  %s1787_s1 = inlined_call_operand.vmem [shape: f32[4,1536], index: 1, kind: input, shape index: {}, may-alias: {0,1,2}]   ;;  %s1788_s2 = inlined_call_operand.vmem [shape: f32[4,1536], index: 2, kind: input, shape index: {}, may-alias: {0,1,2}]   ;;  %s1789_s3 = inlined_call_operand.vmem [shape: f32[1,1536], index: 3, kind: input, shape index: {}]   ;;  %s1790_s4 = inlined_call_operand.vmem [shape: bf16[8,100], index: 4, kind: input, shape index: {}]   ;;  %s1791_s5 = inlined_call_operand.vmem [shape: bf16[8,1536], index: 5, kind: output, shape index: {0}]   ;;  %s1792_s6 = inlined_call_operand.vmem [shape: f32[16,1], index: 6, kind: output, shape index: {1}]   ;;  %s1793_s7 = inlined_call_operand.vmem [shape: f32[16,1], index: 7, kind: output, shape index: {2}]  }
   0x1   :  { %s1403_s26 = smov 0   ;;  %s1405_s27 = smov 0  }
   0x2   :  { %s1407_s28 = smov 0  }
   0x3 LB: > { %s27_s29 = sadd.s32 1, %s1329_s26  ;;  %s30_s30 = sadd.s32 1, %s1333_s27  ;;  %s1337_s28 = sphi %s1407_s28, %s18_s28   ;;  %s1333_s27 = sphi %s1405_s27, %s1803_s27   ;;  %s1329_s26 = sphi %s1403_s26, %s1802_s26   ;;  %s1325_s25 = sphi %s1401_s25, %s1801_s25   ;;  %s1321_s24 = sphi %s1399_s24, %s1800_s24  }
   0x4   : > { %p28_p0 = scmp.ge.s32.totalorder %s27_s29, 2  ;;  %p1195_p1 = scmp.ge.s32.totalorder %s1337_s28, 1 }
   0x5   : > { %p349_p2 = scmp.lt.s32.totalorder %s1337_s28, 5 }
   0x6   : > { %s1805_s29 = smov (%p28_p0, %s27_s29), 0  ;;  %s1807_s30 = smov (!%p28_p0, %s30_s30), %s1333_s27 }
   0x7   : > { %p350_p3 = pnand %p1195_p1, %p349_p2  ;;  %p32_p4 = scmp.ge.s32.totalorder %s1807_s30, 2 }
   0x8   : > { %s1196_s8 = sshll.u32 (!%p350_p3), %s1325_s25, 1  ;;  %s1339_s22 = smov (!%p350_p3), 105  }
   0x9   : > { %s1809_s30 = smov (%p32_p4, %s1807_s30), 0  ;;  %353 = sbr.rel (%p350_p3) target bundleno = 801 (0x321), region = 40 }
   0xa   : > { %s420_s9 = sadd.s32 (!%p350_p3), %s1321_s24, %s1196_s8  ;;  %s1340_s23 = smov (!%p350_p3), 109  }
   0xb   : > { %s1227_s10 = sshll.u32 (!%p350_p3), %s420_s9, 1  ;;  %s1341_s8 = smov (!%p350_p3), 108  }
   0xc   : > { %s1232_s11 = sadd.s32 (!%p350_p3), 4, %s1227_s10  ;;  %s1435_s12 = sadd.s32 (!%p350_p3), 2, %s1227_s10 }
   0xd   : > { %p449_p5 = scmp.lt.s32.totalorder (!%p350_p3), %s1232_s11, 11  ;;  %p437_p6 = scmp.lt.s32.totalorder (!%p350_p3), %s1435_s12, 11 }
   0xe   : > { %s1342_s9 = smov 107   ;;  %s1343_s10 = smov 106   ;;  %vm580_vm0 = vcmask 859136   ;;  %vm647_vm1 = vcmask 1041408   ;;  %vm553_vm2 = vcmask 883712   ;;  %vm657_vm3 = vcmask 1043456  }
   0xf   : > { %s1811_s11 = smov (!%p449_p5, %s1232_s11), 11  ;;  %s1795_s15 = smov 125   ;;  %vm562_vm4 = vcmask 875520   ;;  %vm749_vm5 = vcmask 891904   ;;  %vm571_vm6 = vcmask 867328   ;;  %vm664_vm7 = vcmask 1045504  }
  0x10   : > { %s1439_s13 = scalar_select %p437_p6, %s1435_s12, 11  ;;  %vm511_vm8 = vcmask 1039360   ;;  %vm523_vm9 = vcmask 1031168   ;;  %vm535_vm10 = vcmask 1022976   ;;  %vm624_vm11 = vcmask 695296  }
  0x11   : > { %s1205_s14 = sshll.u32 %s1811_s11, 2  ;;  %s1796_s11 = smov 127   ;;  %vm634_vm12 = vcmask 687104   ;;  %vm614_vm13 = vcmask 703488   ;;  %vm644_vm14 = vcmask 556032   ;;  %vm589_vm15 = vcmask 850944  }
  0x12   : > { %s452_s17 = scalar_lea.vmem %s1788_s2, %s1205_s14  ;;  %s1794_s18 = sshll.u32 %s1439_s13, 2 }
  0x13   : > { %v491_v0 = vld [vmem:[%s452_s17] sm:$0xf]  ;;  %s440_s21 = scalar_lea.vmem %s1787_s1, %s1794_s18  ;;  %s1345_s14 = smov 126  }
  0x14   : > { %v1450_v1 = vpack.c.bf16 %v491_v0, %v491_v0  ;;  %v490_v2 = vld [vmem:[%s440_s21] sm:$0xff]  ;;  %s1347_s16 = smov 86   ;;  %s1198_s17 = sadd.s32 4294967295, %s1435_s12 }
  0x15   : > { %v493_v3 = vcombine.high %v490_v2, %v490_v2  ;;  %v1452_v4 = vpack.c.bf16 %v490_v2, %v490_v2  ;;  %s1348_s19 = smov 85   ;;  %p424_p7 = scmp.lt.s32.totalorder %s1198_s17, 11 }
  0x16   : > { %761 = vrot.lane.b32.xlu1 %v1450_v1, %s1339_s22  ;;  %v617_v7 = vrot.slane %v1450_v1, 6  ;;  %v627_v10 = vrot.slane %v1450_v1, 4  ;;  %v637_v14 = vrot.slane %v1450_v1, 2  ;;  %s1349_s20 = smov 84   ;;  %s1351_s12 = smov 104  }
  0x17   : > { %v1456_v5 = vpack.c.bf16 %v493_v3, %v493_v3  ;;  %576 = vrot.lane.b32.xlu0 %v1452_v4, %s1339_s22  ;;  %v503_v6 = vrot.slane %v1452_v4, 6  ;;  %v515_v8 = vrot.slane %v1452_v4, 4  ;;  %v527_v13 = vrot.slane %v1452_v4, 2  ;;  %s1813_s17 = smov (!%p424_p7, %s1198_s17), 11  ;;  %s1352_s18 = smov 88  }
  0x18   : > { %s1199_s21 = sshll.u32 %s1813_s17, 2  ;;  %p480_p8 = scmp.lt.s32.totalorder %s1325_s25, 1 }
  0x19   : > { %v504_v9 = vrot.slane %v1456_v5, 6  ;;  %v516_v11 = vrot.slane %v1456_v5, 4  ;;  %v528_v12 = vrot.slane %v1456_v5, 2  ;;  %p1216_p9 = scmp.ne.s32.totalorder %s1321_s24, 0 }
  0x1a   : > { %743 = vrot.lane.b32.xlu1 %v1452_v4, %s1340_s23  ;;  %s1815_s25 = smov (!%p480_p8, %s1325_s25), 1 }
  0x1b   : > { %578 = vrot.lane.b32.xlu0 %v1456_v5, %s1339_s22 }
  0x1e   : > { %747 = vrot.lane.b32.xlu1 %v1450_v1, %s1340_s23 }
  0x1f   : > { %745 = vrot.lane.b32.xlu0 %v1456_v5, %s1340_s23 }
  0x22   : > { %549 = vrot.lane.b32.xlu1 %v503_v6, %s1341_s8 }
  0x23   : > { %752 = vrot.lane.b32.xlu0 %v617_v7, %s1341_s8 }
  0x26   : > { %558 = vrot.lane.b32.xlu1 %v515_v8, %s1342_s9 }
  0x27   : > { %551 = vrot.lane.b32.xlu0 %v504_v9, %s1341_s8 }
  0x2a   : > { %755 = vrot.lane.b32.xlu1 %v627_v10, %s1342_s9 }
  0x2b   : > { %560 = vrot.lane.b32.xlu0 %v516_v11, %s1342_s9 }
  0x2e   : > { %569 = vrot.lane.b32.xlu1 %v528_v12, %s1343_s10 }
  0x2f   : > { %567 = vrot.lane.b32.xlu0 %v527_v13, %s1343_s10 }
  0x32   : > { %507 = vrot.lane.b32.xlu1 %v503_v6, %s1796_s11 }
  0x33   : > { %758 = vrot.lane.b32.xlu0 %v637_v14, %s1343_s10 }
  0x36   : > { %734 = vrot.lane.b32.xlu1 %v617_v7, %s1796_s11 }
  0x37   : > { %509 = vrot.lane.b32.xlu0 %v504_v9, %s1796_s11  ;;  %s1350_s11 = smov 68  }
  0x3a   : > { %521 = vrot.lane.b32.xlu1 %v516_v11, %s1345_s14 }
  0x3b   : > { %519 = vrot.lane.b32.xlu0 %v515_v8, %s1345_s14 }
  0x3e   : > { %531 = vrot.lane.b32.xlu1 %v527_v13, %s1795_s15 }
  0x3f   : > { %737 = vrot.lane.b32.xlu0 %v627_v10, %s1345_s14 }
  0x42   : > { %740 = vrot.lane.b32.xlu1 %v637_v14, %s1795_s15 }
  0x43   : > { %533 = vrot.lane.b32.xlu0 %v528_v12, %s1795_s15  ;;  %s427_s15 = scalar_lea.vmem %s1786_s0, %s1199_s21 }
  0x44   : > { %v489_v15 = vld [vmem:[%s427_s15] sm:$0xf]  ;;  %s1354_s15 = smov 124  }
  0x45   : > { %v1498_v16 = vpack.c.bf16 %v489_v15, %v489_v15 }
  0x46   : > { %610 = vrot.lane.b32.xlu1 %v1452_v4, %s1347_s16 }
  0x47   : > { %612 = vrot.lane.b32.xlu0 %v1456_v5, %s1347_s16  ;;  %v1501_v17 = vrot.slane %v1498_v16, 6  ;;  %v1507_v18 = vrot.slane %v1498_v16, 4  ;;  %v1511_v19 = vrot.slane %v1498_v16, 2 }
  0x4a   : > { %618 = vrot.lane.b32.xlu1 %v503_v6, %s1348_s19 }
  0x4b   : > { %620 = vrot.lane.b32.xlu0 %v504_v9, %s1348_s19 }
  0x4e   : > { %622 = vrot.lane.b32.xlu1 %v617_v7, %s1348_s19 }
  0x4f   : > { %628 = vrot.lane.b32.xlu0 %v515_v8, %s1349_s20 }
  0x52   : > { %630 = vrot.lane.b32.xlu1 %v516_v11, %s1349_s20 }
  0x53   : > { %632 = vrot.lane.b32.xlu0 %v627_v10, %s1349_s20 }
  0x56   : > { %638 = vrot.lane.b32.xlu1 %v527_v13, %s1350_s11 }
  0x57   : > { %640 = vrot.lane.b32.xlu0 %v528_v12, %s1350_s11 }
  0x5a   : > { %642 = vrot.lane.b32.xlu1 %v637_v14, %s1350_s11  ;;  %s1353_s11 = smov 87  }
  0x5b   : > { %585 = vrot.lane.b32.xlu0 %v503_v6, %s1351_s12 }
  0x5e   : > { %587 = vrot.lane.b32.xlu1 %v504_v9, %s1351_s12 }
  0x5f   : > { %574 = vrot.lane.b32.xlu0 %v1498_v16, %s1339_s22  ;;  %s1355_s22 = smov 67  }
  0x62   : > { %583 = vrot.lane.b32.xlu1 %v1501_v17, %s1351_s12 }
  0x63   : > { %594 = vrot.lane.b32.xlu0 %v515_v8, %s1352_s18 }
  0x66   : > { %596 = vrot.lane.b32.xlu1 %v516_v11, %s1352_s18 }
  0x67   : > { %592 = vrot.lane.b32.xlu0 %v1507_v18, %s1352_s18 }
  0x6a   : > { %603 = vrot.lane.b32.xlu1 %v527_v13, %s1353_s11 }
  0x6b   : > { %605 = vrot.lane.b32.xlu0 %v528_v12, %s1353_s11 }
  0x6e   : > { %601 = vrot.lane.b32.xlu1 %v1511_v19, %s1353_s11 }
  0x6f   : > { %540 = vrot.lane.b32.xlu0 %v1452_v4, %s1354_s15 }
  0x88   : > { %v762_v20 = vpop.permute.xlu1 %761 }
  0x89   : > { %v1516_v21 = vpop.permute.xlu0 %576  ;;  %817 = vrot.lane.b32.xlu0 %v762_v20, %s1355_s22 }
  0x8c   : > { %v744_v22 = vpop.permute.xlu1 %743 }
  0x8d   : > { %v1519_v23 = vpop.permute.xlu0 %578 }
  0x8e   : > { %v1524_v24 = vsel %vm580_vm0, %v1516_v21, %v1519_v23  ;;  %v763_v25 = vsel %vm580_vm0, %v1519_v23, %v762_v20 }
  0x8f   : > { %813 = vrot.lane.b32.xlu0 %v1524_v24, %s1355_s22  ;;  %815 = vrot.lane.b32.xlu1 %v763_v25, %s1355_s22 }
  0x90   : > { %v748_v26 = vpop.permute.xlu1 %747 }
  0x91   : > { %v746_v27 = vpop.permute.xlu0 %745 }
  0x92   : > { %v750_v43 = vsel %vm749_vm5, %v744_v22, %v746_v27  ;;  %v751_v62 = vsel %vm749_vm5, %v746_v27, %v748_v26  ;;  %vm598_vm5 = vcmask 719872  }
  0x94   : > { %v1531_v28 = vpop.permute.xlu1 %549 }
  0x95   : > { %v753_v29 = vpop.permute.xlu0 %752 }
  0x96   : > { %v784_v36 = vsel %vm647_vm1, %v748_v26, %v753_v29 }
  0x98   : > { %v1533_v30 = vpop.permute.xlu1 %558 }
  0x99   : > { %v1535_v31 = vpop.permute.xlu0 %551 }
  0x9a   : > { %v1549_v38 = vsel %vm553_vm2, %v1531_v28, %v1535_v31  ;;  %v754_v59 = vsel %vm553_vm2, %v1535_v31, %v753_v29 }
  0x9b   : > { %v778_v45 = vsel %vm647_vm1, %v750_v43, %v1549_v38  ;;  %v781_v9 = vsel %vm647_vm1, %v751_v62, %v754_v59 }
  0x9c   : > { %v756_v32 = vpop.permute.xlu1 %755 }
  0x9d   : > { %v1537_v33 = vpop.permute.xlu0 %560  ;;  %v789_v39 = vsel %vm657_vm3, %v784_v36, %v756_v32 }
  0x9e   : > { %v1555_v41 = vsel %vm562_vm4, %v1533_v30, %v1537_v33  ;;  %v757_v63 = vsel %vm562_vm4, %v1537_v33, %v756_v32 }
  0x9f   : > { %v785_v48 = vsel %vm657_vm3, %v778_v45, %v1555_v41  ;;  %v787_v13 = vsel %vm657_vm3, %v781_v9, %v757_v63 }
  0xa0   : > { %v1539_v34 = vpop.permute.xlu1 %569 }
  0xa1   : > { %v1541_v35 = vpop.permute.xlu0 %567 }
  0xa2   : > { %v1562_v44 = vsel %vm571_vm6, %v1541_v35, %v1539_v34 }
  0xa3   : > { %v790_v50 = vsel %vm664_vm7, %v785_v48, %v1562_v44 }
  0xa4   : > { %v1544_v37 = vpop.permute.xlu1 %507 }
  0xa5   : > { %v759_v40 = vpop.permute.xlu0 %758 }
  0xa6   : > { %v794_v42 = vsel %vm664_vm7, %v789_v39, %v759_v40  ;;  %v760_v3 = vsel %vm571_vm6, %v1539_v34, %v759_v40 }
  0xa7   : > { %811 = vrot.lane.b32.xlu1 %v794_v42, %s1355_s22  ;;  %v792_v20 = vsel %vm664_vm7, %v787_v13, %v760_v3 }
  0xa8   : > { %v735_v46 = vpop.permute.xlu1 %734 }
  0xa9   : > { %v510_v47 = vpop.permute.xlu0 %509  ;;  %v768_v57 = vsel %vm647_vm1, %v1450_v1, %v735_v46 }
  0xaa   : > { %v656_v49 = vsel %vm647_vm1, %v1456_v5, %v510_v47  ;;  %v736_v56 = vsel %vm511_vm8, %v510_v47, %v735_v46  ;;  %v513_v11 = vsel %vm511_vm8, %v1544_v37, %v510_v47 }
  0xab   : > { %807 = vrot.lane.b32.xlu1 %v790_v50, %s1355_s22  ;;  %v765_v0 = vsel %vm647_vm1, %v1456_v5, %v736_v56  ;;  %v653_v25 = vsel %vm647_vm1, %v1452_v4, %v513_v11 }
  0xac   : > { %v522_v51 = vpop.permute.xlu1 %521 }
  0xad   : > { %v663_v52 = vsel %vm657_vm3, %v656_v49, %v522_v51  ;;  %v1575_v53 = vpop.permute.xlu0 %519 }
  0xae   : > { %v525_v14 = vsel %vm523_vm9, %v1575_v53, %v522_v51 }
  0xaf   : > { %v661_v27 = vsel %vm657_vm3, %v653_v25, %v525_v14 }
  0xb0   : > { %v1577_v54 = vpop.permute.xlu1 %531 }
  0xb1   : > { %v738_v55 = vpop.permute.xlu0 %737 }
  0xb2   : > { %v739_v58 = vsel %vm523_vm9, %v522_v51, %v738_v55  ;;  %v772_v60 = vsel %vm657_vm3, %v768_v57, %v738_v55 }
  0xb3   : > { %v770_v7 = vsel %vm657_vm3, %v765_v0, %v739_v58 }
  0xb4   : > { %v741_v61 = vpop.permute.xlu1 %740 }
  0xb5   : > { %v534_v2 = vpop.permute.xlu0 %533  ;;  %v776_v1 = vsel %vm664_vm7, %v772_v60, %v741_v61 }
  0xb6   : > { %v742_v6 = vsel %vm535_vm10, %v534_v2, %v741_v61  ;;  %805 = vrot.lane.b32.xlu0 %v776_v1, %s1355_s22  ;;  %v1598_v8 = vsel %vm664_vm7, %v663_v52, %v534_v2  ;;  %v537_v22 = vsel %vm535_vm10, %v1577_v54, %v534_v2 }
  0xb7   : > { %v774_v10 = vsel %vm664_vm7, %v770_v7, %v742_v6  ;;  %v1618_v32 = vsel %vm664_vm7, %v661_v27, %v537_v22 }
  0xb8   : > { %803 = vrot.lane.b32.xlu1 %v774_v10, %s1355_s22  ;;  %v611_v12 = vpop.permute.xlu1 %610 }
  0xb9   : > { %v613_v15 = vpop.permute.xlu0 %612 }
  0xba   : > { %809 = vrot.lane.b32.xlu0 %v792_v20, %s1355_s22  ;;  %v615_v48 = vsel %vm614_vm13, %v611_v12, %v613_v15 }
  0xbc   : > { %542 = vrot.lane.b32.xlu1 %v1456_v5, %s1354_s15  ;;  %v619_v26 = vpop.permute.xlu1 %618 }
  0xbd   : > { %v621_v29 = vpop.permute.xlu0 %620  ;;  %v715_v46 = vsel %vm647_vm1, %v611_v12, %v619_v26 }
  0xbe   : > { %801 = vrot.lane.b32.xlu0 %v1618_v32, %s1355_s22  ;;  %v625_v49 = vsel %vm624_vm11, %v619_v26, %v621_v29  ;;  %s1799_s22 = sshll.u32 %s1439_s13, 2 }
  0xbf   : > { %v718_v55 = vsel %vm647_vm1, %v615_v48, %v625_v49 }
  0xc0   : > { %547 = vrot.lane.b32.xlu1 %v1501_v17, %s1341_s8  ;;  %v623_v36 = vpop.permute.xlu1 %622  ;;  %s1797_s8 = smov 127  }
  0xc1   : > { %v629_v39 = vpop.permute.xlu0 %628  ;;  %v626_v5 = vsel %vm624_vm11, %v621_v29, %v623_v36  ;;  %vm607_vm11 = vcmask 711680  }
  0xc2   : > { %538 = vrot.lane.b32.xlu0 %v1498_v16, %s1354_s15  ;;  %v721_v42 = vsel %vm647_vm1, %v613_v15, %v626_v5  ;;  %v723_v51 = vsel %vm657_vm3, %v715_v46, %v629_v39  ;;  %s463_s15 = scalar_lea.vmem %s1789_s3, %s1439_s13 }
  0xc4   : > { %565 = vrot.lane.b32.xlu1 %v1511_v19, %s1343_s10  ;;  %v631_v4 = vpop.permute.xlu1 %630  ;;  %s1356_s10 = smov 42  }
  0xc5   : > { %v633_v40 = vpop.permute.xlu0 %632 }
  0xc6   : > { %556 = vrot.lane.b32.xlu0 %v1507_v18, %s1342_s9  ;;  %v636_v43 = vsel %vm634_vm12, %v631_v4, %v633_v40  ;;  %s1798_s9 = smov 125  }
  0xc7   : > { %v727_v50 = vsel %vm657_vm3, %v721_v42, %v636_v43 }
  0xc8   : > { %517 = vrot.lane.b32.xlu1 %v1507_v18, %s1345_s14  ;;  %v639_v45 = vpop.permute.xlu1 %638  ;;  %v635_v18 = vsel %vm634_vm12, %v629_v39, %v631_v4  ;;  %s1211_s14 = sshll.u32 %s1815_s25, 3  ;;  %vm544_vm12 = vcmask 1014784  }
  0xc9   : > { %v641_v47 = vpop.permute.xlu0 %640  ;;  %v729_v59 = vsel %vm664_vm7, %v723_v51, %v639_v45  ;;  %v725_v61 = vsel %vm657_vm3, %v718_v55, %v635_v18  ;;  %s1666_s19 = scalar_lea.vmem %s1792_s6, %s1211_s14  ;;  %s1671_s23 = scalar_lea.vmem %s1793_s7, %s1211_s14 }
  0xca   : > { %505 = vrot.lane.b32.xlu0 %v1501_v17, %s1797_s8  ;;  %v645_v17 = vsel %vm644_vm14, %v639_v45, %v641_v47 }
  0xcb   : > { %v731_v0 = vsel %vm664_vm7, %v725_v61, %v645_v17 }
  0xcc   : > { %v643_v52 = vpop.permute.xlu1 %642 }
  0xcd   : > { %v646_v56 = vsel %vm644_vm14, %v641_v47, %v643_v52  ;;  %v586_v57 = vpop.permute.xlu0 %585 }
  0xce   : > { %529 = vrot.lane.b32.xlu0 %v1511_v19, %s1798_s9  ;;  %v733_v58 = vsel %vm664_vm7, %v727_v50, %v646_v56 }
  0xcf   : > { %860 = vrot.lane.b32.xlu1 %v733_v58, %s1356_s10 }
  0xd0   : > { %v588_v60 = vpop.permute.xlu1 %587 }
  0xd1   : > { %v591_v62 = vsel %vm589_vm15, %v586_v57, %v588_v60  ;;  %v575_v63 = vpop.permute.xlu0 %574  ;;  %v700_v52 = vsel %vm647_vm1, %v1519_v23, %v588_v60 }
  0xd2   : > { %856 = vrot.lane.b32.xlu0 %v729_v59, %s1356_s10  ;;  %v581_v19 = vsel %vm580_vm0, %v575_v63, %v1516_v21  ;;  %v697_v9 = vsel %vm647_vm1, %v1524_v24, %v591_v62  ;;  %vm819_vm0 = vcmask 547840  }
  0xd4   : > { %v584_v2 = vpop.permute.xlu1 %583 }
  0xd5   : > { %v595_v1 = vpop.permute.xlu0 %594  ;;  %v590_v3 = vsel %vm589_vm15, %v584_v2, %v586_v57 }
  0xd6   : > { %v694_v6 = vsel %vm647_vm1, %v581_v19, %v590_v3  ;;  %858 = vrot.lane.b32.xlu0 %v731_v0, %s1356_s10  ;;  %v1357_v3 = vmov 0  }
  0xd7   : > { %949 = vmatprep.mubr.bf16.mxu0 %v1357_v3 }
  0xd8   : > { %v597_v7 = vpop.permute.xlu1 %596 }
  0xd9   : > { %v593_v10 = vpop.permute.xlu0 %592  ;;  %v600_v11 = vsel %vm598_vm5, %v595_v1, %v597_v7  ;;  %v706_v56 = vsel %vm657_vm3, %v700_v52, %v597_v7 }
  0xda   : > { %v599_v12 = vsel %vm598_vm5, %v593_v10, %v595_v1  ;;  %v704_v13 = vsel %vm657_vm3, %v697_v9, %v600_v11 }
  0xdb   : > { %v702_v21 = vsel %vm657_vm3, %v694_v6, %v599_v12 }
  0xdc   : > { %v604_v14 = vpop.permute.xlu1 %603 }
  0xdd   : > { %v606_v15 = vpop.permute.xlu0 %605 }
  0xde   : > { %v609_v20 = vsel %vm607_vm11, %v604_v14, %v606_v15  ;;  %v712_v59 = vsel %vm664_vm7, %v706_v56, %v606_v15 }
  0xdf   : > { %v710_v22 = vsel %vm664_vm7, %v704_v13, %v609_v20 }
  0xe0   : > { %v602_v25 = vpop.permute.xlu1 %601 }
  0xe1   : > { %v608_v26 = vsel %vm607_vm11, %v602_v25, %v604_v14  ;;  %v541_v29 = vpop.permute.xlu0 %540 }
  0xe2   : > { %v708_v27 = vsel %vm664_vm7, %v702_v21, %v608_v26 }
  0xfb   : > { %v818_v24 = vpop.permute.xlu0 %817 }
 0x101   : > { %v814_v36 = vpop.permute.xlu0 %813  ;;  %v816_v39 = vpop.permute.xlu1 %815 }
 0x102   : > { %874 = vrot.lane.b32.xlu1 %v814_v36, %s1356_s10  ;;  %v824_v4 = vsel %vm819_vm0, %v814_v36, %v816_v39  ;;  %v825_v5 = vsel %vm819_vm0, %v816_v39, %v818_v24 }
 0x103   : > { %876 = vrot.lane.b32.xlu0 %v824_v4, %s1356_s10 }
 0x106   : > { %878 = vrot.lane.b32.xlu1 %v825_v5, %s1356_s10 }
 0x119   : > { %v812_v40 = vpop.permute.xlu1 %811 }
 0x11d   : > { %v808_v42 = vpop.permute.xlu1 %807 }
 0x11e   : > { %868 = vrot.lane.b32.xlu0 %v808_v42, %s1356_s10 }
 0x128   : > { %v806_v43 = vpop.permute.xlu0 %805 }
 0x12a   : > { %v804_v45 = vpop.permute.xlu1 %803 }
 0x12b   : > { %v821_v51 = vsel %vm819_vm0, %v804_v45, %v806_v43 }
 0x12c   : > { %v810_v46 = vpop.permute.xlu0 %809 }
 0x12d   : > { %v822_v47 = vsel %vm819_vm0, %v808_v42, %v810_v46  ;;  %v823_v58 = vsel %vm819_vm0, %v810_v46, %v812_v40 }
 0x12e   : > { %v543_v48 = vpop.permute.xlu1 %542  ;;  %870 = vrot.lane.b32.xlu0 %v822_v47, %s1356_s10 }
 0x12f   : > { %v546_v49 = vsel %vm544_vm12, %v541_v29, %v543_v48  ;;  %v679_v1 = vsel %vm647_vm1, %v543_v48, %v1535_v31 }
 0x130   : > { %v802_v50 = vpop.permute.xlu0 %801  ;;  %v676_v55 = vsel %vm647_vm1, %v546_v49, %v1549_v38 }
 0x131   : > { %862 = vrot.lane.b32.xlu1 %v802_v50, %s1356_s10  ;;  %v683_v23 = vsel %vm657_vm3, %v676_v55, %v1555_v41  ;;  %v820_v61 = vsel %vm819_vm0, %v802_v50, %v804_v45 }
 0x132   : > { %866 = vrot.lane.b32.xlu0 %v821_v51, %s1356_s10  ;;  %v548_v18 = vpop.permute.xlu1 %547  ;;  %v689_v2 = vsel %vm664_vm7, %v683_v23, %v1562_v44  ;;  %v685_v44 = vsel %vm657_vm3, %v679_v1, %v1537_v33 }
 0x133   : > { %v554_v38 = vsel %vm553_vm2, %v548_v18, %v1531_v28  ;;  %vm880_vm2 = vcmask 343040  }
 0x134   : > { %v539_v57 = vpop.permute.xlu0 %538 }
 0x135   : > { %872 = vrot.lane.b32.xlu1 %v823_v58, %s1356_s10  ;;  %v545_v17 = vsel %vm544_vm12, %v539_v57, %v541_v29  ;;  %v826_v57 = vld [vmem:[%s1790_s4] sm:$0xf]  ;;  %v960_v58 = vlaneseq }
 0x136   : > { %854 = vrot.lane.b32.xlu0 %v712_v59, %s1356_s10  ;;  %v673_v62 = vsel %vm647_vm1, %v545_v17, %v554_v38  ;;  %v566_v63 = vpop.permute.xlu1 %565  ;;  %v958_v38 = vld [vmem:[%s463_s15] sm:$0x3] }
 0x137   : > { %v572_v28 = vsel %vm571_vm6, %v566_v63, %v1541_v35  ;;  %v691_v35 = vsel %vm664_vm7, %v685_v44, %v1539_v34  ;;  %v961_v59 = vshrl.u32 %v960_v58, 7 }
 0x138   : > { %v557_v60 = vpop.permute.xlu0 %556 }
 0x139   : > { %v563_v0 = vsel %vm562_vm4, %v557_v60, %v1533_v30  ;;  %864 = vrot.lane.b32.xlu1 %v820_v61, %s1356_s10  ;;  %v962_v17 = vsub.s32 0, %v961_v59  ;;  %v966_v23 = vsub.s32 1, %v961_v59 }
 0x13a   : > { %846 = vrot.lane.b32.xlu0 %v689_v2, %s1356_s10  ;;  %v681_v41 = vsel %vm657_vm3, %v673_v62, %v563_v0  ;;  %v518_v7 = vpop.permute.xlu1 %517 }
 0x13b   : > { %v687_v19 = vsel %vm664_vm7, %v681_v41, %v572_v28  ;;  %v963_v60 = vrot.slane %v958_v38, %v962_v17  ;;  %v967_v61 = vrot.slane %v958_v38, %v966_v23 }
 0x13c   : > { %v506_v30 = vpop.permute.xlu0 %505 }
 0x13d   : > { %852 = vrot.lane.b32.xlu1 %v710_v22, %s1356_s10  ;;  %v512_v6 = vsel %vm511_vm8, %v506_v30, %v1544_v37 }
 0x13e   : > { %844 = vrot.lane.b32.xlu0 %v687_v19, %s1356_s10  ;;  %v650_v9 = vsel %vm647_vm1, %v1498_v16, %v512_v6 }
 0x140   : > { %v530_v31 = vpop.permute.xlu0 %529 }
 0x141   : > { %850 = vrot.lane.b32.xlu1 %v708_v27, %s1356_s10  ;;  %v536_v33 = vsel %vm535_vm10, %v530_v31, %v1577_v54  ;;  %v861_v11 = vpop.permute.xlu1 %860 }
 0x142   : > { %842 = vrot.lane.b32.xlu0 %v1598_v8, %s1356_s10  ;;  %v524_v8 = vsel %vm523_vm9, %v518_v7, %v1575_v53 }
 0x143   : > { %v659_v34 = vsel %vm657_vm3, %v650_v9, %v524_v8 }
 0x144   : > { %v666_v37 = vsel %vm664_vm7, %v659_v34, %v536_v33  ;;  %v857_v10 = vpop.permute.xlu0 %856 }
 0x145   : > { %848 = vrot.lane.b32.xlu1 %v691_v35, %s1356_s10 }
 0x148   : > { %v859_v12 = vpop.permute.xlu0 %858 }
 0x149   : > { %840 = vrot.lane.b32.xlu1 %v1618_v32, %s1356_s10  ;;  %v888_v4 = vsel %vm880_vm2, %v859_v12, %v861_v11  ;;  %v887_v42 = vsel %vm880_vm2, %v857_v10, %v859_v12 }
 0x14d   : > { %838 = vrot.lane.b32.xlu1 %v666_v37, %s1356_s10  ;;  %s475_s10 = scalar_lea.vmem %s1791_s5, %s1799_s22 }
 0x174   : > { %v875_v13 = vpop.permute.xlu1 %874 }
 0x175   : > { %v877_v16 = vpop.permute.xlu0 %876 }
 0x176   : > { %v893_v54 = vsel %vm880_vm2, %v875_v13, %v877_v16 }
 0x177   : > { %v912_v53 = vsel %vm647_vm1, %v893_v54, 0 }
 0x178   : > { %v879_v21 = vpop.permute.xlu1 %878 }
 0x179   : > { %v894_v32 = vsel %vm880_vm2, %v877_v16, %v879_v21 }
 0x17a   : > { %1213 = vmatprep.subr.msk.bf16.mxu0 %vm647_vm1, %v894_v32  ;;  %vm907_vm1 = vcmask 818176  }
 0x17b   : > { %920 = vmatpush1.bf16.msra.mxu0 %v912_v53 }
 0x190   : > { %v869_v14 = vpop.permute.xlu0 %868 }
 0x1a0   : > { %v871_v15 = vpop.permute.xlu0 %870 }
 0x1a1   : > { %v891_v29 = vsel %vm880_vm2, %v869_v14, %v871_v15 }
 0x1a3   : > { %v863_v20 = vpop.permute.xlu1 %862 }
 0x1a4   : > { %v867_v22 = vpop.permute.xlu0 %866 }
 0x1a7   : > { %v873_v25 = vpop.permute.xlu1 %872 }
 0x1a8   : > { %v892_v26 = vsel %vm880_vm2, %v871_v15, %v873_v25  ;;  %v855_v27 = vpop.permute.xlu0 %854 }
 0x1a9   : > { %921 = vmatprep.subr.bf16.mxu0 %v892_v26 }
 0x1aa   : > { %922 = vmatpush1.bf16.msra.mxu0 %v891_v29 }
 0x1ab   : > { %v865_v24 = vpop.permute.xlu1 %864 }
 0x1ac   : > { %v890_v36 = vsel %vm880_vm2, %v865_v24, %v867_v22  ;;  %v889_v39 = vsel %vm880_vm2, %v863_v20, %v865_v24  ;;  %v847_v5 = vpop.permute.xlu0 %846 }
 0x1ad   : > { %923 = vmatprep.subr.bf16.mxu0 %v890_v36 }
 0x1ae   : > { %924 = vmatpush1.bf16.msra.mxu0 %v889_v39 }
 0x1af   : > { %925 = vmatprep.subr.bf16.mxu0 %v888_v4  ;;  %v853_v40 = vpop.permute.xlu1 %852 }
 0x1b0   : > { %v886_v43 = vsel %vm880_vm2, %v853_v40, %v855_v27  ;;  %v845_v47 = vpop.permute.xlu0 %844 }
 0x1b1   : > { %v883_v50 = vsel %vm880_vm2, %v845_v47, %v847_v5 }
 0x1b2   : > { %926 = vmatpush1.bf16.msra.mxu0 %v887_v42 }
 0x1b3   : > { %927 = vmatprep.subr.bf16.mxu0 %v886_v43  ;;  %v851_v45 = vpop.permute.xlu1 %850 }
 0x1b4   : > { %v885_v46 = vsel %vm880_vm2, %v851_v45, %v853_v40  ;;  %v843_v51 = vpop.permute.xlu0 %842 }
 0x1b6   : > { %928 = vmatpush1.bf16.msra.mxu0 %v885_v46 }
 0x1b7   : > { %v849_v48 = vpop.permute.xlu1 %848 }
 0x1b8   : > { %v884_v49 = vsel %vm880_vm2, %v847_v5, %v849_v48 }
 0x1b9   : > { %929 = vmatprep.subr.bf16.mxu0 %v884_v49 }
 0x1ba   : > { %930 = vmatpush1.bf16.msra.mxu0 %v883_v50 }
 0x1bb   : > { %v841_v52 = vpop.permute.xlu1 %840 }
 0x1bc   : > { %v882_v55 = vsel %vm880_vm2, %v841_v52, %v843_v51 }
 0x1bd   : > { %931 = vmatprep.subr.bf16.mxu0 %v882_v55 }
 0x1bf   : > { %v839_v18 = vpop.permute.xlu1 %838 }
 0x1c0   : > { %v881_v56 = vsel %vm880_vm2, %v839_v18, %v841_v52 }
 0x1c1   : > { %932 = vmatpush1.bf16.msra.mxu0 %v881_v56 }
 0x1c4   : > { %1214 = vmatmul.mubr.msk.bf16.vlgmr.msra.gmra.mxu0 %vm907_vm1, %v826_v57 }
 0x284   : > { %v951_v62 = vpop.f32.mrf.mxu0 }
 0x285   : > { %v970_v0 = vmul.f32 %v963_v60, %v951_v62 }
 0x286   : > { %v953_v63 = vpop.f32.mrf.mxu0 }
 0x287   : > { %v971_v2 = vmul.f32 %v967_v61, %v953_v63  ;;  %984 = sbr.rel (%p1216_p9) target bundleno = 654 (0x28e), region = 44 }
 0x288   : > { %v955_v41 = vpop.f32.mrf.mxu0 }
 0x289   : > { %v1237_v28 = vpack.c.bf16 %v971_v2, %v970_v0 }
 0x28a   : > { %v956_v19 = vpop.f32.mrf.mxu0 }
 0x28b   : > { %980 = vst [vmem:[%s475_s10] sm:$0xff] %v1237_v28 }
 0x28c   : > { %vm985_vm3 = vcmask 7168   ;;  %v1358_v1 = vmov 0.0  }
 0x28d   : > { %986 = vst.msk [vmem:[%s1666_s19] sm:$0xff] %vm985_vm3, %v1358_v1  ;;  %987 = vst.msk [vmem:[%s1671_s23] sm:$0xff] %vm985_vm3, %v1358_v1 }
 0x28e PF: > { %v989_v30 = vadd.f32 %v971_v2, %v970_v0  ;;  %v996_v44 = vmul.f32 %v970_v0, %v970_v0  ;;  %v997_v3 = vmul.f32 %v971_v2, %v971_v2  ;;  %vm993_vm4 = vcmask 7168  }
 0x290   : > { %990 = vadd.xlane.f32.xlu0 %v989_v30  ;;  %v998_v35 = vadd.f32 %v997_v3, %v996_v44 }
 0x294   : > { %999 = vadd.xlane.f32.xlu0 %v998_v35  ;;  %v988_v6 = vld [vmem:[%s1666_s19] sm:$0xff] }
 0x295   : > { %v995_v9 = vld [vmem:[%s1671_s23] sm:$0xff] }
 0x319   : > { %v991_v31 = vpop.xlane.xlu0 %990 }
 0x31a   : > { %v992_v7 = vadd.f32 %v991_v31, %v988_v6 }
 0x31c   : > { %994 = vst.msk [vmem:[%s1666_s19] sm:$0xff] %vm993_vm4, %v992_v7 }
 0x31d   : > { %v1000_v33 = vpop.xlane.xlu0 %999 }
 0x31e   : > { %v1001_v8 = vadd.f32 %v1000_v33, %v995_v9 }
 0x320   : > { %1002 = vst.msk [vmem:[%s1671_s23] sm:$0xff] %vm993_vm4, %v1001_v8 }
 0x321 PF: > { %s18_s28 = sadd.s32 1, %s1337_s28   ;;  %s1800_s24 = smov %s1329_s26 }
 0x322   : > { %p15_p10 = scmp.ge.s32.totalorder %s18_s28, 6   ;;  %s1801_s25 = smov %s1333_s27 }
 0x323   : > { %s1802_s26 = smov %s1805_s29  ;;  %s1803_s27 = smov %s1809_s30 }
 0x324   :  { %17 = sbr.rel (!%p15_p10) target bundleno = 3 (0x3), region = 107 }

// kernel: residual_block_forward.4
= control target key start
LH: loop header
LB: loop body
LE: loop exit
PB: predicated region body
PF: predicated region fallthrough
CT: control target
= control target key end

     0   :  { %s1847_s17 = smov 0   ;;  %s1849_s18 = smov 0   ;;  %s2380_s0 = inlined_call_operand.vmem [shape: bf16[8,1536], index: 0, kind: input, shape index: {}, may-alias: {0,1,2}]   ;;  %s2381_s1 = inlined_call_operand.vmem [shape: bf16[8,1536], index: 1, kind: input, shape index: {}, may-alias: {0,1,2}]   ;;  %s2382_s2 = inlined_call_operand.vmem [shape: bf16[8,1536], index: 2, kind: input, shape index: {}, may-alias: {0,1,2}]   ;;  %s2383_s3 = inlined_call_operand.vmem [shape: f32[1,1536], index: 3, kind: input, shape index: {}, may-alias: {3,4,5}]   ;;  %s2384_s4 = inlined_call_operand.vmem [shape: f32[1,1536], index: 4, kind: input, shape index: {}, may-alias: {3,4,5}]   ;;  %s2385_s5 = inlined_call_operand.vmem [shape: f32[1,1536], index: 5, kind: input, shape index: {}, may-alias: {3,4,5}]   ;;  %s2386_s6 = inlined_call_operand.vmem [shape: bf16[8,200], index: 6, kind: input, shape index: {}]   ;;  %s2387_s7 = inlined_call_operand.vmem [shape: f32[8,1], index: 7, kind: input, shape index: {}]   ;;  %s2388_s8 = inlined_call_operand.vmem [shape: f32[8,1], index: 8, kind: input, shape index: {}]   ;;  %s2389_s9 = inlined_call_operand.vmem [shape: bf16[8,1536], index: 9, kind: output, shape index: {0}]   ;;  %s2390_s10 = inlined_call_operand.vmem [shape: f32[16,1], index: 10, kind: output, shape index: {1}]   ;;  %s2391_s11 = inlined_call_operand.vmem [shape: f32[16,1], index: 11, kind: output, shape index: {2}]  }
   0x1   :  { %s1851_s19 = smov 0   ;;  %s1853_s20 = smov 0  }
   0x2   :  { %s1855_s21 = smov 0  }
   0x3 LB: > { %s31_s22 = sadd.s32 1, %s1757_s19  ;;  %s34_s23 = sadd.s32 1, %s1761_s20  ;;  %s1765_s21 = sphi %s1855_s21, %s22_s21   ;;  %s1761_s20 = sphi %s1853_s20, %s2397_s20   ;;  %s1757_s19 = sphi %s1851_s19, %s2396_s19   ;;  %s1753_s18 = sphi %s1849_s18, %s2395_s18   ;;  %s1749_s17 = sphi %s1847_s17, %s2394_s17  }
   0x4   : > { %p32_p0 = scmp.ge.s32.totalorder %s31_s22, 2  ;;  %p1590_p1 = scmp.ge.s32.totalorder %s1765_s21, 1 }
   0x5   : > { %p501_p2 = scmp.lt.s32.totalorder %s1765_s21, 5 }
   0x6   : > { %s2399_s22 = smov (%p32_p0, %s31_s22), 0  ;;  %s2401_s23 = smov (!%p32_p0, %s34_s23), %s1761_s20 }
   0x7   : > { %p502_p3 = pnand %p1590_p1, %p501_p2  ;;  %p36_p4 = scmp.ge.s32.totalorder %s2401_s23, 2 }
   0x8   : > { %s1591_s28 = sshll.u32 (!%p502_p3), %s1753_s18, 1  ;;  %s1770_s16 = smov (!%p502_p3), 109  }
   0x9   : > { %s2403_s23 = smov (%p36_p4, %s2401_s23), 0  ;;  %505 = sbr.rel (%p502_p3) target bundleno = 1005 (0x3ed), region = 56 }
   0xa   : > { %s595_s29 = sadd.s32 (!%p502_p3), %s1749_s17, %s1591_s28  ;;  %s1779_s27 = smov (!%p502_p3), 127  }
   0xb   : > { %s1639_s30 = sshll.u32 (!%p502_p3), %s595_s29, 1  ;;  %p679_p8 = scmp.lt.s32.totalorder (!%p502_p3), %s1753_s18, 1 }
   0xc   : > { %s1890_s12 = sadd.s32 (!%p502_p3), 2, %s1639_s30  ;;  %s1644_s13 = sadd.s32 (!%p502_p3), 4, %s1639_s30 }
   0xd   : > { %p612_p5 = scmp.lt.s32.totalorder (!%p502_p3), %s1890_s12, 11  ;;  %p624_p6 = scmp.lt.s32.totalorder (!%p502_p3), %s1644_s13, 11 }
   0xe   : > { %v716_v0 = vld [vmem:[%s2387_s7] sm:$0xff]  ;;  %v1767_v1 = vmov 0   ;;  %s1593_s30 = sadd.s32 4294967295, %s1890_s12  ;;  %v702_v18 = vlaneseq  ;;  %vm883_vm8 = vcmask 859136   ;;  %vm936_vm9 = vcmask 687104   ;;  %s2409_s18 = smov (!%p679_p8, %s1753_s18), 1 }
   0xf   : > { %1714 = vset.pattern.permute.xlu0 %v1767_v1  ;;  %v726_v2 = vld [vmem:[%s2388_s8] sm:$0xff]  ;;  %s1894_s14 = scalar_select %p612_p5, %s1890_s12, 11  ;;  %vm917_vm10 = vcmask 703488   ;;  %vm901_vm11 = vcmask 719872   ;;  %vm948_vm12 = vcmask 1043456   ;;  %vm847_vm13 = vcmask 1014784  }
  0x10   : > { %719 = vperm.xlu0 %1714, %v716_v0   ;;  %s2405_s13 = smov (!%p624_p6, %s1644_s13), 11  ;;  %p599_p7 = scmp.lt.s32.totalorder %s1593_s30, 11  ;;  %v703_v25 = vshrl.u32 %v702_v18, 7  ;;  %vm829_vm14 = vcmask 1031168   ;;  %vm865_vm15 = vcmask 875520  }
  0x11   : > { %s2392_s15 = sshll.u32 %s1894_s14, 2  ;;  %s1600_s26 = sshll.u32 %s2405_s13, 2 }
  0x12   : > { %s615_s25 = scalar_lea.vmem %s2381_s1, %s2392_s15  ;;  %s627_s29 = scalar_lea.vmem %s2382_s2, %s1600_s26  ;;  %v1915_v32 = vsub.s32 0, %v703_v25  ;;  %v708_v37 = vsub.s32 1, %v703_v25 }
  0x13   : > { %v689_v3 = vld [vmem:[%s615_s25] sm:$0xff]  ;;  %s2407_s30 = smov (!%p599_p7, %s1593_s30), 11  ;;  %s651_s24 = scalar_lea.vmem %s2384_s4, %s1894_s14 }
  0x14   : > { %729 = vperm.xlu0 %1714, %v726_v2   ;;  %v1613_v4 = vcombine.low %v689_v3, %v689_v3  ;;  %v1614_v5 = vcombine.high %v689_v3, %v689_v3  ;;  %v690_v6 = vld [vmem:[%s627_s29] sm:$0xf]  ;;  %s1594_s25 = sshll.u32 %s2407_s30, 2  ;;  %s662_s12 = scalar_lea.vmem %s2385_s5, %s2405_s13 }
  0x15   : > { %v715_v9 = vunpack.c.l.bf16 %v690_v6  ;;  %v699_v35 = vld [vmem:[%s651_s24] sm:$0x3]  ;;  %s602_s28 = scalar_lea.vmem %s2380_s0, %s1594_s25  ;;  %s1768_s13 = smov 105  }
  0x16   : > { %v713_v7 = vunpack.c.l.bf16 %v1613_v4  ;;  %v714_v8 = vunpack.c.l.bf16 %v1614_v5  ;;  %v1926_v38 = vrot.slane %v699_v35, %v1915_v32  ;;  %v1928_v39 = vrot.slane %v699_v35, %v708_v37  ;;  %v688_v40 = vld [vmem:[%s602_s28] sm:$0xf]  ;;  %s1769_s15 = smov 107   ;;  %s1771_s24 = smov 126  }
  0x17   : > { %v700_v41 = vld [vmem:[%s662_s12] sm:$0x1]  ;;  %v712_v42 = vunpack.c.l.bf16 %v688_v40  ;;  %s1772_s25 = smov 84   ;;  %s639_s28 = scalar_lea.vmem %s2383_s3, %s2407_s30 }
  0x18   : > { %vm773_vm0 = vcmp.gt.f32.partialorder %v1926_v38, 0.5  ;;  %vm774_vm1 = vcmp.gt.f32.partialorder %v1928_v39, 0.5  ;;  %vm775_vm2 = vcmp.gt.f32.partialorder %v700_v41, 0.5  ;;  %s1773_s29 = smov 86   ;;  %s1774_s12 = smov 88  }
  0x19   : > { %v777_v43 = vsel %vm773_vm0, 1, %v1767_v1  ;;  %v778_v44 = vsel %vm774_vm1, 1, %v1767_v1  ;;  %v779_v45 = vsel %vm775_vm2, 1, %v1767_v1  ;;  %s1775_s30 = smov 124   ;;  %s1778_s26 = smov 125   ;;  %vm874_vm0 = vcmask 867328  }
  0x1a   : > { %v787_v47 = vrot.slane %v777_v43, %v1915_v32  ;;  %v791_v50 = vrot.slane %v778_v44, %v1915_v32  ;;  %v795_v51 = vrot.slane %v779_v45, %v1915_v32  ;;  %vm856_vm1 = vcmask 883712   ;;  %p1620_p9 = scmp.ne.s32.totalorder %s1749_s17, 0 }
  0x1b   : > { %vm838_vm2 = vcmask 1022976  }
  0x1c   : > { %vm797_vm3 = vcmp.eq.s32.totalorder %v787_v47, 1  ;;  %vm798_vm4 = vcmp.eq.s32.totalorder %v791_v50, 1  ;;  %vm799_vm5 = vcmp.eq.s32.totalorder %v795_v51, 1 }
  0x8b   : > { %v720_v10 = vpop.permute.xlu0 %719 }
  0x8c   : > { %v723_v11 = vmul.f32 %v720_v10, %v713_v7  ;;  %v724_v12 = vmul.f32 %v720_v10, %v714_v8  ;;  %v725_v13 = vmul.f32 %v720_v10, %v715_v9  ;;  %v722_v46 = vmul.f32 %v720_v10, %v712_v42 }
  0x8f   : > { %v730_v14 = vpop.permute.xlu0 %729 }
  0x90   : > { %v733_v15 = vadd.f32 %v730_v14, %v723_v11  ;;  %v734_v16 = vadd.f32 %v730_v14, %v724_v12  ;;  %v735_v17 = vadd.f32 %v730_v14, %v725_v13  ;;  %v732_v48 = vadd.f32 %v730_v14, %v722_v46  ;;  %v698_v11 = vld [vmem:[%s639_s28] sm:$0x1]  ;;  %s1782_s28 = smov 87  }
  0x91   : > { %vm772_vm6 = vcmp.gt.f32.partialorder %v698_v11, 0.5 }
  0x92   : > { %v741_v19 = vmul.f32 0.044715, %v733_v15  ;;  %v742_v20 = vmul.f32 0.044715, %v734_v16  ;;  %v743_v21 = vmul.f32 0.044715, %v735_v17 }
  0x93   : > { %v737_v53 = vmul.f32 0.5, %v733_v15  ;;  %v738_v56 = vmul.f32 0.5, %v734_v16  ;;  %v739_v58 = vmul.f32 0.5, %v735_v17  ;;  %v740_v59 = vmul.f32 0.044715, %v732_v48 }
  0x94   : > { %v745_v22 = vmul.f32 %v741_v19, %v733_v15  ;;  %v746_v23 = vmul.f32 %v742_v20, %v734_v16  ;;  %v747_v24 = vmul.f32 %v743_v21, %v735_v17  ;;  %v776_v13 = vsel %vm772_vm6, 1, %v1767_v1 }
  0x95   : > { %v744_v3 = vmul.f32 %v740_v59, %v732_v48  ;;  %vm927_vm6 = vcmask 695296  }
  0x96   : > { %v749_v26 = vmul.f32 %v745_v22, %v733_v15  ;;  %v750_v27 = vmul.f32 %v746_v23, %v734_v16  ;;  %v751_v28 = vmul.f32 %v747_v24, %v735_v17 }
  0x97   : > { %v748_v8 = vmul.f32 %v744_v3, %v732_v48 }
  0x98   : > { %v753_v29 = vadd.f32 %v749_v26, %v733_v15  ;;  %v754_v30 = vadd.f32 %v750_v27, %v734_v16  ;;  %v755_v31 = vadd.f32 %v751_v28, %v735_v17  ;;  %v783_v15 = vrot.slane %v776_v13, %v1915_v32 }
  0x99   : > { %v752_v9 = vadd.f32 %v748_v8, %v732_v48  ;;  %v736_v16 = vmul.f32 0.5, %v732_v48 }
  0x9a   : > { %v757_v33 = vmul.f32 0.7978846, %v753_v29  ;;  %v758_v34 = vmul.f32 0.7978846, %v754_v30  ;;  %v759_v36 = vmul.f32 0.7978846, %v755_v31 }
  0x9b   : > { %v756_v10 = vmul.f32 0.7978846, %v752_v9  ;;  %vm796_vm7 = vcmp.eq.s32.totalorder %v783_v15, 1 }
  0x9c   : > { %1719 = vtanh.f32 %v757_v33 }
  0x9d   : > { %1721 = vtanh.f32 %v758_v34 }
  0x9e   : > { %1723 = vtanh.f32 %v759_v36 }
  0x9f   : > { %1725 = vtanh.f32 %v756_v10 }
  0xa9   : > { %v1720_v49 = vpop.eup %1719 }
  0xaa   : > { %v1722_v52 = vpop.eup %1721  ;;  %v765_v54 = vadd.f32 1.0, %v1720_v49 }
  0xab   : > { %v1724_v55 = vpop.eup %1723  ;;  %v766_v57 = vadd.f32 1.0, %v1722_v52 }
  0xac   : > { %v767_v60 = vadd.f32 1.0, %v1724_v55  ;;  %v769_v61 = vmul.f32 %v765_v54, %v737_v53  ;;  %v1726_v12 = vpop.eup %1725 }
  0xad   : > { %v770_v62 = vmul.f32 %v766_v57, %v738_v56  ;;  %v764_v14 = vadd.f32 1.0, %v1726_v12 }
  0xae   : > { %v771_v63 = vmul.f32 %v767_v60, %v739_v58  ;;  %v801_v0 = vsel %vm797_vm3, %v769_v61, 0.0  ;;  %vm1036_vm3 = vcmask 891904  }
  0xaf   : > { %v1938_v2 = vpack.c.bf16 %v801_v0, %v801_v0  ;;  %v802_v4 = vsel %vm798_vm4, %v770_v62, 0.0  ;;  %v768_v17 = vmul.f32 %v764_v14, %v736_v16  ;;  %vm820_vm4 = vcmask 1039360  }
  0xb0   : > { %v803_v5 = vsel %vm799_vm5, %v771_v63, 0.0  ;;  %v1944_v7 = vpack.c.bf16 %v802_v4, %v802_v4  ;;  %vm945_vm5 = vcmask 556032  }
  0xb1   : > { %v1940_v6 = vpack.c.bf16 %v803_v5, %v803_v5  ;;  %879 = vrot.lane.b32.xlu1 %v1938_v2, %s1768_s13  ;;  %v800_v1 = vsel %vm796_vm7, %v768_v17, 0.0  ;;  %v812_v21 = vrot.slane %v1938_v2, 4  ;;  %vm910_vm7 = vcmask 711680  }
  0xb2   : > { %v813_v18 = vrot.slane %v1944_v7, 4  ;;  %v1983_v20 = vpack.c.bf16 %v800_v1, %v800_v1 }
  0xb3   : > { %1048 = vrot.lane.b32.xlu0 %v1940_v6, %s1768_s13  ;;  %v920_v19 = vrot.slane %v1940_v6, 4 }
  0xb4   : > { %v811_v22 = vrot.slane %v1983_v20, 4 }
  0xb5   : > { %881 = vrot.lane.b32.xlu1 %v1944_v7, %s1768_s13 }
  0xb7   : > { %863 = vrot.lane.b32.xlu0 %v1944_v7, %s1769_s15 }
  0xb9   : > { %861 = vrot.lane.b32.xlu1 %v1938_v2, %s1769_s15 }
  0xbb   : > { %1032 = vrot.lane.b32.xlu0 %v1944_v7, %s1770_s16 }
  0xbd   : > { %1042 = vrot.lane.b32.xlu1 %v1940_v6, %s1769_s15 }
  0xbf   : > { %827 = vrot.lane.b32.xlu0 %v1944_v7, %s1771_s24 }
  0xc1   : > { %1030 = vrot.lane.b32.xlu1 %v1938_v2, %s1770_s16 }
  0xc3   : > { %930 = vrot.lane.b32.xlu0 %v1938_v2, %s1772_s25 }
  0xc5   : > { %1034 = vrot.lane.b32.xlu1 %v1940_v6, %s1770_s16  ;;  %s1776_s16 = smov 106  }
  0xc7   : > { %934 = vrot.lane.b32.xlu0 %v1940_v6, %s1772_s25 }
  0xc9   : > { %825 = vrot.lane.b32.xlu1 %v1938_v2, %s1771_s24 }
  0xcb   : > { %913 = vrot.lane.b32.xlu0 %v1938_v2, %s1773_s29 }
  0xcd   : > { %1024 = vrot.lane.b32.xlu1 %v1940_v6, %s1771_s24 }
  0xcf   : > { %899 = vrot.lane.b32.xlu0 %v1944_v7, %s1774_s12 }
  0xd1   : > { %932 = vrot.lane.b32.xlu1 %v1944_v7, %s1772_s25  ;;  %s1777_s25 = smov 108  }
  0xd3   : > { %845 = vrot.lane.b32.xlu0 %v1944_v7, %s1775_s30 }
  0xd5   : > { %915 = vrot.lane.b32.xlu1 %v1944_v7, %s1773_s29  ;;  %s1784_s29 = smov 67  }
  0xd7   : > { %872 = vrot.lane.b32.xlu0 %v813_v18, %s1776_s16 }
  0xd9   : > { %897 = vrot.lane.b32.xlu1 %v1938_v2, %s1774_s12 }
  0xdb   : > { %1045 = vrot.lane.b32.xlu0 %v920_v19, %s1776_s16 }
  0xdd   : > { %895 = vrot.lane.b32.xlu1 %v1983_v20, %s1774_s12  ;;  %s1785_s12 = smov 42  }
  0xdf   : > { %854 = vrot.lane.b32.xlu0 %v813_v18, %s1777_s25 }
  0xe1   : > { %877 = vrot.lane.b32.xlu1 %v1983_v20, %s1768_s13  ;;  %s1780_s13 = smov 68  }
  0xe3   : > { %1039 = vrot.lane.b32.xlu0 %v920_v19, %s1777_s25 }
  0xe5   : > { %859 = vrot.lane.b32.xlu1 %v1983_v20, %s1769_s15  ;;  %s1781_s15 = smov 85  }
  0xe7   : > { %836 = vrot.lane.b32.xlu0 %v813_v18, %s1778_s26 }
  0xe9   : > { %843 = vrot.lane.b32.xlu1 %v1938_v2, %s1775_s30 }
  0xeb   : > { %1027 = vrot.lane.b32.xlu0 %v920_v19, %s1778_s26 }
  0xed   : > { %841 = vrot.lane.b32.xlu1 %v1983_v20, %s1775_s30  ;;  %s1611_s30 = sshll.u32 %s2409_s18, 3 }
  0xee   : > { %s2219_s18 = scalar_lea.vmem %s2391_s11, %s1611_s30 }
  0xef   : > { %818 = vrot.lane.b32.xlu0 %v813_v18, %s1779_s27 }
  0xf1   : > { %823 = vrot.lane.b32.xlu1 %v1983_v20, %s1771_s24  ;;  %s1783_s24 = smov 104  }
  0xf3   : > { %941 = vrot.lane.b32.xlu0 %v813_v18, %s1780_s13 }
  0xf5   : > { %870 = vrot.lane.b32.xlu1 %v812_v21, %s1776_s16 }
  0xf7   : > { %921 = vrot.lane.b32.xlu0 %v812_v21, %s1781_s15 }
  0xf9   : > { %852 = vrot.lane.b32.xlu1 %v812_v21, %s1777_s25 }
  0xfb   : > { %925 = vrot.lane.b32.xlu0 %v920_v19, %s1781_s15 }
  0xfd   : > { %834 = vrot.lane.b32.xlu1 %v812_v21, %s1778_s26 }
  0xff   : > { %908 = vrot.lane.b32.xlu0 %v813_v18, %s1782_s28 }
 0x101   : > { %816 = vrot.lane.b32.xlu1 %v812_v21, %s1779_s27 }
 0x103   : > { %904 = vrot.lane.b32.xlu0 %v811_v22, %s1782_s28 }
 0x105   : > { %1021 = vrot.lane.b32.xlu1 %v920_v19, %s1779_s27 }
 0x107   : > { %890 = vrot.lane.b32.xlu0 %v813_v18, %s1783_s24 }
 0x109   : > { %939 = vrot.lane.b32.xlu1 %v812_v21, %s1780_s13 }
 0x10b   : > { %886 = vrot.lane.b32.xlu0 %v811_v22, %s1783_s24 }
 0x10d   : > { %943 = vrot.lane.b32.xlu1 %v920_v19, %s1780_s13 }
 0x10f   : > { %868 = vrot.lane.b32.xlu0 %v811_v22, %s1776_s16 }
 0x111   : > { %923 = vrot.lane.b32.xlu1 %v813_v18, %s1781_s15 }
 0x113   : > { %850 = vrot.lane.b32.xlu0 %v811_v22, %s1777_s25 }
 0x115   : > { %906 = vrot.lane.b32.xlu1 %v812_v21, %s1782_s28 }
 0x117   : > { %832 = vrot.lane.b32.xlu0 %v811_v22, %s1778_s26  ;;  %s2214_s26 = scalar_lea.vmem %s2390_s10, %s1611_s30 }
 0x119   : > { %888 = vrot.lane.b32.xlu1 %v812_v21, %s1783_s24  ;;  %s2393_s24 = sshll.u32 %s1894_s14, 2 }
 0x11a   : > { %s674_s30 = scalar_lea.vmem %s2389_s9, %s2393_s24 }
 0x11d   : > { %814 = vrot.lane.b32.xlu1 %v811_v22, %s1779_s27 }
 0x123   : > { %v880_v23 = vpop.permute.xlu1 %879 }
 0x125   : > { %v1049_v24 = vpop.permute.xlu0 %1048 }
 0x126   : > { %1116 = vrot.lane.b32.xlu0 %v1049_v24, %s1784_s29 }
 0x127   : > { %v2007_v25 = vpop.permute.xlu1 %881 }
 0x128   : > { %v1050_v26 = vsel %vm883_vm8, %v2007_v25, %v1049_v24  ;;  %v2013_v27 = vsel %vm883_vm8, %v880_v23, %v2007_v25 }
 0x129   : > { %v2015_v28 = vpop.permute.xlu0 %863  ;;  %1114 = vrot.lane.b32.xlu1 %v1050_v26, %s1784_s29 }
 0x12a   : > { %1112 = vrot.lane.b32.xlu0 %v2013_v27, %s1784_s29 }
 0x12b   : > { %v2020_v29 = vpop.permute.xlu1 %861 }
 0x12d   : > { %v2022_v30 = vpop.permute.xlu0 %1032 }
 0x12f   : > { %v2024_v31 = vpop.permute.xlu1 %1042 }
 0x131   : > { %v2026_v32 = vpop.permute.xlu0 %827 }
 0x133   : > { %v2028_v33 = vpop.permute.xlu1 %1030 }
 0x135   : > { %v2030_v34 = vpop.permute.xlu0 %930 }
 0x137   : > { %v2032_v35 = vpop.permute.xlu1 %1034 }
 0x139   : > { %v935_v36 = vpop.permute.xlu0 %934 }
 0x13b   : > { %v2034_v37 = vpop.permute.xlu1 %825 }
 0x13d   : > { %v914_v40 = vpop.permute.xlu0 %913 }
 0x13f   : > { %v2036_v41 = vpop.permute.xlu1 %1024 }
 0x141   : > { %v900_v42 = vpop.permute.xlu0 %899 }
 0x143   : > { %v2038_v43 = vpop.permute.xlu1 %932 }
 0x144   : > { %v2042_v44 = vsel %vm936_vm9, %v2038_v43, %v935_v36 }
 0x145   : > { %v2044_v45 = vpop.permute.xlu0 %845 }
 0x147   : > { %v2046_v46 = vpop.permute.xlu1 %915 }
 0x148   : > { %v2049_v47 = vsel %vm917_vm10, %v914_v40, %v2046_v46  ;;  %vm1235_vm10 = vcmask 343040  }
 0x149   : > { %v2051_v48 = vpop.permute.xlu0 %872 }
 0x14b   : > { %v898_v49 = vpop.permute.xlu1 %897 }
 0x14c   : > { %v2053_v50 = vsel %vm901_vm11, %v898_v49, %v900_v42 }
 0x14d   : > { %v2055_v51 = vpop.permute.xlu0 %1045 }
 0x14e   : > { %v1075_v52 = vsel %vm948_vm12, %v2024_v31, %v2055_v51 }
 0x14f   : > { %1110 = vrot.lane.b32.xlu1 %v1075_v52, %s1784_s29  ;;  %v896_v53 = vpop.permute.xlu1 %895 }
 0x150   : > { %v2061_v54 = vsel %vm901_vm11, %v896_v53, %v898_v49  ;;  %vm1286_vm11 = vcmask 588800  }
 0x151   : > { %v2063_v55 = vpop.permute.xlu0 %854 }
 0x153   : > { %v878_v56 = vpop.permute.xlu1 %877 }
 0x154   : > { %v2066_v57 = vsel %vm883_vm8, %v878_v56, %v880_v23  ;;  %vm892_vm8 = vcmask 850944  }
 0x155   : > { %v2068_v58 = vpop.permute.xlu0 %1039 }
 0x156   : > { %v1069_v59 = vsel %vm948_vm12, %v2032_v35, %v2068_v58 }
 0x157   : > { %1104 = vrot.lane.b32.xlu0 %v1069_v59, %s1784_s29  ;;  %v860_v60 = vpop.permute.xlu1 %859 }
 0x159   : > { %v2074_v61 = vpop.permute.xlu0 %836 }
 0x15b   : > { %v844_v62 = vpop.permute.xlu1 %843 }
 0x15c   : > { %v2077_v63 = vsel %vm847_vm13, %v844_v62, %v2044_v45 }
 0x15d   : > { %v2079_v0 = vpop.permute.xlu0 %1027 }
 0x15e   : > { %v1061_v3 = vsel %vm948_vm12, %v2036_v41, %v2079_v0 }
 0x15f   : > { %1098 = vrot.lane.b32.xlu1 %v1061_v3, %s1784_s29  ;;  %v842_v4 = vpop.permute.xlu1 %841  ;;  %v966_v3 = vsel %vm948_vm12, %v2026_v32, %v2074_v61 }
 0x160   : > { %v848_v5 = vsel %vm847_vm13, %v842_v4, %v844_v62 }
 0x161   : > { %v2085_v8 = vpop.permute.xlu0 %818 }
 0x162   : > { %v957_v4 = vsel %vm948_vm12, %v1944_v7, %v2085_v8 }
 0x163   : > { %v824_v9 = vpop.permute.xlu1 %823 }
 0x164   : > { %v830_v10 = vsel %vm829_vm14, %v824_v9, %v2034_v37 }
 0x165   : > { %v2089_v11 = vpop.permute.xlu0 %941 }
 0x167   : > { %v871_v12 = vpop.permute.xlu1 %870 }
 0x168   : > { %v876_v9 = vsel %vm874_vm0, %v871_v12, %v2051_v48 }
 0x169   : > { %v2091_v13 = vpop.permute.xlu0 %921 }
 0x16a   : > { %v1005_v26 = vsel %vm948_vm12, %v914_v40, %v2091_v13  ;;  %v866_v40 = vsel %vm865_vm15, %v860_v60, %v2020_v29 }
 0x16b   : > { %v853_v14 = vpop.permute.xlu1 %852 }
 0x16d   : > { %v2093_v15 = vpop.permute.xlu0 %925 }
 0x16f   : > { %v835_v16 = vpop.permute.xlu1 %834 }
 0x171   : > { %v2095_v17 = vpop.permute.xlu0 %908 }
 0x173   : > { %v2097_v18 = vpop.permute.xlu1 %816 }
 0x175   : > { %v2099_v1 = vpop.permute.xlu0 %904 }
 0x177   : > { %v2101_v19 = vpop.permute.xlu1 %1021 }
 0x178   : > { %v1055_v21 = vsel %vm948_vm12, %v1940_v6, %v2101_v19  ;;  %v1002_v6 = vsel %vm948_vm12, %v900_v42, %v2095_v17  ;;  %v984_v42 = vsel %vm948_vm12, %v2015_v28, %v2051_v48 }
 0x179   : > { %v2106_v22 = vpop.permute.xlu0 %890  ;;  %1092 = vrot.lane.b32.xlu0 %v1055_v21, %s1784_s29 }
 0x17a   : > { %v993_v49 = vsel %vm948_vm12, %v2007_v25, %v2106_v22  ;;  %v975_v25 = vsel %vm948_vm12, %v2044_v45, %v2063_v55  ;;  %v1047_v45 = vsel %vm874_vm0, %v2051_v48, %v2055_v51  ;;  %v1044_v51 = vsel %vm865_vm15, %v2015_v28, %v2024_v31 }
 0x17b   : > { %v2109_v23 = vpop.permute.xlu1 %939  ;;  %v1038_v31 = vsel %vm1036_vm3, %v2022_v30, %v2032_v35  ;;  %v1026_v35 = vsel %vm829_vm14, %v2026_v32, %v2036_v41 }
 0x17c   : > { %v1014_v24 = vsel %vm948_vm12, %v2030_v34, %v2109_v23 }
 0x17d   : > { %v2116_v36 = vpop.permute.xlu0 %886  ;;  %1199 = vrot.lane.b32.xlu1 %v1014_v24, %s1785_s12  ;;  %1193 = vrot.lane.b32.xlu0 %v1005_v26, %s1785_s12  ;;  %v867_v24 = vsel %vm865_vm15, %v2020_v29, %v2015_v28  ;;  %v858_v29 = vsel %vm856_vm1, %v853_v14, %v2063_v55  ;;  %v1037_v28 = vsel %vm1036_vm3, %v2028_v33, %v2022_v30 }
 0x17e   : > { %v831_v30 = vsel %vm829_vm14, %v2034_v37, %v2026_v32 }
 0x17f   : > { %v944_v48 = vpop.permute.xlu1 %943 }
 0x181   : > { %v869_v52 = vpop.permute.xlu0 %868  ;;  %1191 = vrot.lane.b32.xlu0 %v1002_v6, %s1785_s12  ;;  %1185 = vrot.lane.b32.xlu1 %v993_v49, %s1785_s12  ;;  %v2170_v6 = vsel %vm948_vm12, %v867_v24, %v876_v9  ;;  %v1041_v49 = vsel %vm856_vm1, %v2063_v55, %v2068_v58  ;;  %v1029_v55 = vsel %vm838_vm2, %v2074_v61, %v2079_v0 }
 0x182   : > { %v875_v53 = vsel %vm874_vm0, %v869_v52, %v871_v12  ;;  %v1072_v12 = vsel %vm948_vm12, %v1044_v51, %v1047_v45  ;;  %v1066_v52 = vsel %vm948_vm12, %v1038_v31, %v1041_v49  ;;  %v840_v58 = vsel %vm838_vm2, %v835_v16, %v2074_v61 }
 0x183   : > { %v2131_v56 = vsel %vm948_vm12, %v866_v40, %v875_v53  ;;  %v924_v33 = vpop.permute.xlu1 %923  ;;  %v1058_v0 = vsel %vm948_vm12, %v1026_v35, %v1029_v55  ;;  %v822_v61 = vsel %vm820_vm4, %v2097_v18, %v2085_v8  ;;  %v937_v40 = vsel %vm936_vm9, %v2030_v34, %v2038_v43  ;;  %v2303_v55 = vld [vmem:[%s2386_s6] sm:$0xff] }
 0x184   : > { %v954_v37 = vsel %vm948_vm12, %v1938_v2, %v822_v61  ;;  %vm1118_vm9 = vcmask 547840  }
 0x185   : > { %v851_v59 = vpop.permute.xlu0 %850  ;;  %1179 = vrot.lane.b32.xlu0 %v984_v42, %s1785_s12  ;;  %1173 = vrot.lane.b32.xlu1 %v975_v25, %s1785_s12 }
 0x186   : > { %v857_v60 = vsel %vm856_vm1, %v851_v59, %v853_v14  ;;  %v963_v14 = vsel %vm948_vm12, %v831_v30, %v840_v58  ;;  %v1616_v58 = vcombine.high %v2303_v55, %v2303_v55 }
 0x187   : > { %v2143_v62 = vsel %vm948_vm12, %v848_v5, %v857_v60  ;;  %v907_v32 = vpop.permute.xlu1 %906 }
 0x188   : > { %v912_v43 = vsel %vm910_vm7, %v907_v32, %v2095_v17  ;;  %v911_v25 = vsel %vm910_vm7, %v2099_v1, %v907_v32  ;;  %1618 = vmatprep.mubr.msk.bf16.mxu0 %vm1286_vm11, %v1616_v58 }
 0x189   : > { %v833_v21 = vpop.permute.xlu0 %832  ;;  %1167 = vrot.lane.b32.xlu0 %v966_v3, %s1785_s12  ;;  %1161 = vrot.lane.b32.xlu1 %v957_v4, %s1785_s12 }
 0x18a   : > { %v839_v5 = vsel %vm838_vm2, %v833_v21, %v835_v16  ;;  %v1023_v16 = vsel %vm820_vm4, %v2085_v8, %v2101_v19  ;;  %v946_v8 = vsel %vm945_vm5, %v2109_v23, %v2089_v11  ;;  %v947_v19 = vsel %vm945_vm5, %v2089_v11, %v944_v48 }
 0x18b   : > { %v2166_v26 = vsel %vm948_vm12, %v830_v10, %v839_v5  ;;  %v1063_v10 = vsel %vm948_vm12, %v1037_v28, %v858_v29  ;;  %v1052_v41 = vsel %vm948_vm12, %v1944_v7, %v1023_v16  ;;  %v1020_v2 = vsel %vm948_vm12, %v2042_v44, %v947_v19  ;;  %v889_v11 = vpop.permute.xlu1 %888 }
 0x18c   : > { %v1017_v53 = vsel %vm948_vm12, %v937_v40, %v946_v8  ;;  %v928_v7 = vsel %vm927_vm6, %v2091_v13, %v924_v33  ;;  %v929_v23 = vsel %vm927_vm6, %v924_v33, %v2093_v15  ;;  %v894_v44 = vsel %vm892_vm8, %v889_v11, %v2106_v22 }
 0x18d   : > { %1108 = vrot.lane.b32.xlu0 %v1072_v12, %s1784_s29  ;;  %1106 = vrot.lane.b32.xlu1 %v2170_v6, %s1784_s29  ;;  %v1008_v42 = vsel %vm948_vm12, %v2049_v47, %v928_v7  ;;  %v1011_v34 = vsel %vm948_vm12, %v2046_v46, %v929_v23  ;;  %v999_v13 = vsel %vm948_vm12, %v2053_v50, %v912_v43 }
 0x18e   : > { %v990_v15 = vsel %vm948_vm12, %v2013_v27, %v894_v44  ;;  %v893_v47 = vsel %vm892_vm8, %v2116_v36, %v889_v11  ;;  %v996_v46 = vsel %vm948_vm12, %v2061_v54, %v911_v25  ;;  %v972_v27 = vsel %vm948_vm12, %v2077_v63, %v858_v29 }
 0x18f   : > { %v987_v17 = vsel %vm948_vm12, %v2066_v57, %v893_v47  ;;  %v815_v50 = vpop.permute.xlu1 %814 }
 0x190   : > { %v821_v57 = vsel %vm820_vm4, %v815_v50, %v2097_v18 }
 0x191   : > { %1100 = vrot.lane.b32.xlu0 %v1063_v10, %s1784_s29  ;;  %1102 = vrot.lane.b32.xlu1 %v1066_v52, %s1784_s29  ;;  %v951_v63 = vsel %vm948_vm12, %v1983_v20, %v821_v57 }
 0x195   : > { %1096 = vrot.lane.b32.xlu0 %v1058_v0, %s1784_s29  ;;  %1094 = vrot.lane.b32.xlu1 %v963_v14, %s1784_s29 }
 0x198   : > { %v1117_v54 = vpop.permute.xlu0 %1116 }
 0x199   : > { %1088 = vrot.lane.b32.xlu0 %v954_v37, %s1784_s29  ;;  %1090 = vrot.lane.b32.xlu1 %v1052_v41, %s1784_s29 }
 0x19b   : > { %v1115_v1 = vpop.permute.xlu1 %1114 }
 0x19c   : > { %v1113_v22 = vpop.permute.xlu0 %1112  ;;  %v1128_v18 = vsel %vm1118_vm9, %v1115_v1, %v1117_v54 }
 0x19d   : > { %1203 = vrot.lane.b32.xlu0 %v1020_v2, %s1785_s12  ;;  %1201 = vrot.lane.b32.xlu1 %v1017_v53, %s1785_s12  ;;  %v1127_v36 = vsel %vm1118_vm9, %v1113_v22, %v1115_v1 }
 0x1a1   : > { %1195 = vrot.lane.b32.xlu0 %v1008_v42, %s1785_s12  ;;  %1197 = vrot.lane.b32.xlu1 %v1011_v34, %s1785_s12 }
 0x1a5   : > { %1189 = vrot.lane.b32.xlu1 %v999_v13, %s1785_s12  ;;  %1183 = vrot.lane.b32.xlu0 %v990_v15, %s1785_s12 }
 0x1a9   : > { %1187 = vrot.lane.b32.xlu1 %v996_v46, %s1785_s12  ;;  %1181 = vrot.lane.b32.xlu0 %v987_v17, %s1785_s12 }
 0x1ad   : > { %1177 = vrot.lane.b32.xlu1 %v2170_v6, %s1785_s12  ;;  %1171 = vrot.lane.b32.xlu0 %v972_v27, %s1785_s12 }
 0x1b1   : > { %1175 = vrot.lane.b32.xlu1 %v2131_v56, %s1785_s12  ;;  %1169 = vrot.lane.b32.xlu0 %v2143_v62, %s1785_s12 }
 0x1b5   : > { %1165 = vrot.lane.b32.xlu1 %v963_v14, %s1785_s12  ;;  %1159 = vrot.lane.b32.xlu0 %v954_v37, %s1785_s12 }
 0x1b9   : > { %1157 = vrot.lane.b32.xlu0 %v951_v63, %s1785_s12  ;;  %1163 = vrot.lane.b32.xlu1 %v2166_v26, %s1785_s12 }
 0x1bd   : > { %1231 = vrot.lane.b32.xlu0 %v1127_v36, %s1785_s12  ;;  %1229 = vrot.lane.b32.xlu1 %v1113_v22, %s1785_s12 }
 0x1c1   : > { %1233 = vrot.lane.b32.xlu1 %v1128_v18, %s1785_s12  ;;  %v1111_v56 = vpop.permute.xlu1 %1110 }
 0x1c9   : > { %v1105_v20 = vpop.permute.xlu0 %1104 }
 0x1d1   : > { %v1099_v59 = vpop.permute.xlu1 %1098 }
 0x1eb   : > { %v1093_v60 = vpop.permute.xlu0 %1092 }
 0x1ef   : > { %v1200_v62 = vpop.permute.xlu1 %1199  ;;  %v1194_v3 = vpop.permute.xlu0 %1193 }
 0x1f3   : > { %v1186_v4 = vpop.permute.xlu1 %1185  ;;  %v1192_v45 = vpop.permute.xlu0 %1191 }
 0x1f7   : > { %v2285_v9 = vpop.permute.xlu1 %1173  ;;  %v1180_v21 = vpop.permute.xlu0 %1179 }
 0x1fb   : > { %v2287_v5 = vpop.permute.xlu1 %1161  ;;  %v2289_v24 = vpop.permute.xlu0 %1167 }
 0x1ff   : > { %v1107_v51 = vpop.permute.xlu1 %1106  ;;  %v1109_v26 = vpop.permute.xlu0 %1108 }
 0x200   : > { %1223 = vrot.lane.b32.xlu0 %v1107_v51, %s1785_s12  ;;  %v1126_v6 = vsel %vm1118_vm9, %v1109_v26, %v1111_v56  ;;  %v1125_v28 = vsel %vm1118_vm9, %v1107_v51, %v1109_v26 }
 0x203   : > { %v1103_v48 = vpop.permute.xlu1 %1102  ;;  %v1101_v12 = vpop.permute.xlu0 %1100 }
 0x204   : > { %1217 = vrot.lane.b32.xlu1 %v1101_v12, %s1785_s12  ;;  %v1123_v31 = vsel %vm1118_vm9, %v1101_v12, %v1103_v48  ;;  %v1124_v33 = vsel %vm1118_vm9, %v1103_v48, %v1105_v20 }
 0x207   : > { %v1095_v49 = vpop.permute.xlu1 %1094  ;;  %v1097_v29 = vpop.permute.xlu0 %1096 }
 0x208   : > { %1211 = vrot.lane.b32.xlu0 %v1095_v49, %s1785_s12  ;;  %1227 = vrot.lane.b32.xlu1 %v1126_v6, %s1785_s12  ;;  %v1122_v30 = vsel %vm1118_vm9, %v1097_v29, %v1099_v59  ;;  %v1121_v16 = vsel %vm1118_vm9, %v1095_v49, %v1097_v29 }
 0x20b   : > { %v1091_v10 = vpop.permute.xlu1 %1090  ;;  %v1089_v52 = vpop.permute.xlu0 %1088 }
 0x20c   : > { %1225 = vrot.lane.b32.xlu0 %v1125_v28, %s1785_s12  ;;  %1219 = vrot.lane.b32.xlu1 %v1123_v31, %s1785_s12  ;;  %v1119_v32 = vsel %vm1118_vm9, %v1089_v52, %v1091_v10  ;;  %v1120_v40 = vsel %vm1118_vm9, %v1091_v10, %v1093_v60 }
 0x20f   : > { %v1202_v35 = vpop.permute.xlu1 %1201  ;;  %v1204_v0 = vpop.permute.xlu0 %1203 }
 0x210   : > { %1221 = vrot.lane.b32.xlu0 %v1124_v33, %s1785_s12  ;;  %1215 = vrot.lane.b32.xlu1 %v1122_v30, %s1785_s12  ;;  %v1251_v14 = vsel %vm1235_vm10, %v1202_v35, %v1204_v0  ;;  %v1250_v61 = vsel %vm1235_vm10, %v1200_v62, %v1202_v35  ;;  %v1615_v35 = vcombine.low %v2303_v55, %v2303_v55 }
 0x211   : > { %1296 = vmatprep.subr.bf16.mxu0 %v1251_v14 }
 0x212   : > { %1297 = vmatpush1.bf16.msra.mxu0 %v1250_v61 }
 0x213   : > { %v1198_v37 = vpop.permute.xlu1 %1197  ;;  %v1196_v41 = vpop.permute.xlu0 %1195 }
 0x214   : > { %1213 = vrot.lane.b32.xlu0 %v1121_v16, %s1785_s12  ;;  %1207 = vrot.lane.b32.xlu1 %v1119_v32, %s1785_s12  ;;  %v1249_v8 = vsel %vm1235_vm10, %v1196_v41, %v1198_v37  ;;  %v1248_v19 = vsel %vm1235_vm10, %v1194_v3, %v1196_v41 }
 0x215   : > { %1298 = vmatprep.subr.bf16.mxu0 %v1249_v8 }
 0x216   : > { %1299 = vmatpush1.bf16.msra.mxu0 %v1248_v19 }
 0x217   : > { %v1190_v2 = vpop.permute.xlu1 %1189  ;;  %v1184_v53 = vpop.permute.xlu0 %1183 }
 0x218   : > { %1209 = vrot.lane.b32.xlu0 %v1120_v40, %s1785_s12  ;;  %1205 = vrot.lane.b32.xlu1 %v1089_v52, %s1785_s12  ;;  %v1247_v7 = vsel %vm1235_vm10, %v1190_v2, %v1192_v45  ;;  %v1245_v34 = vsel %vm1235_vm10, %v1184_v53, %v1186_v4 }
 0x219   : > { %1300 = vmatprep.subr.bf16.mxu0 %v1247_v7 }
 0x21b   : > { %v1188_v23 = vpop.permute.xlu1 %1187  ;;  %v1182_v11 = vpop.permute.xlu0 %1181 }
 0x21c   : > { %v1246_v42 = vsel %vm1235_vm10, %v1188_v23, %v1190_v2  ;;  %v1244_v13 = vsel %vm1235_vm10, %v1182_v11, %v1184_v53 }
 0x21d   : > { %1301 = vmatpush1.bf16.msra.mxu0 %v1246_v42 }
 0x21e   : > { %1302 = vmatprep.subr.bf16.mxu0 %v1245_v34 }
 0x21f   : > { %v1178_v43 = vpop.permute.xlu1 %1177  ;;  %v1172_v44 = vpop.permute.xlu0 %1171 }
 0x220   : > { %v1243_v15 = vsel %vm1235_vm10, %v1178_v43, %v1180_v21  ;;  %v1241_v17 = vsel %vm1235_vm10, %v1172_v44, %v2285_v9 }
 0x221   : > { %1303 = vmatpush1.bf16.msra.mxu0 %v1244_v13 }
 0x222   : > { %1304 = vmatprep.subr.bf16.mxu0 %v1243_v15 }
 0x223   : > { %v1176_v25 = vpop.permute.xlu1 %1175  ;;  %v1170_v47 = vpop.permute.xlu0 %1169 }
 0x224   : > { %v1242_v46 = vsel %vm1235_vm10, %v1176_v25, %v1178_v43  ;;  %v1240_v54 = vsel %vm1235_vm10, %v1170_v47, %v1172_v44 }
 0x225   : > { %1305 = vmatpush1.bf16.msra.mxu0 %v1242_v46 }
 0x226   : > { %1306 = vmatprep.subr.bf16.mxu0 %v1241_v17 }
 0x227   : > { %v1166_v27 = vpop.permute.xlu1 %1165  ;;  %v1160_v50 = vpop.permute.xlu0 %1159 }
 0x228   : > { %v1239_v57 = vsel %vm1235_vm10, %v1166_v27, %v2289_v24  ;;  %v1237_v36 = vsel %vm1235_vm10, %v1160_v50, %v2287_v5 }
 0x229   : > { %1307 = vmatpush1.bf16.msra.mxu0 %v1240_v54 }
 0x22a   : > { %1308 = vmatprep.subr.bf16.mxu0 %v1239_v57 }
 0x22b   : > { %v1164_v63 = vpop.permute.xlu1 %1163  ;;  %v1158_v1 = vpop.permute.xlu0 %1157 }
 0x22c   : > { %v1238_v22 = vsel %vm1235_vm10, %v1164_v63, %v1166_v27  ;;  %v1236_v20 = vsel %vm1235_vm10, %v1158_v1, %v1160_v50 }
 0x22d   : > { %1309 = vmatpush1.bf16.msra.mxu0 %v1238_v22 }
 0x22e   : > { %1310 = vmatprep.subr.bf16.mxu0 %v1237_v36 }
 0x22f   : > { %v1230_v18 = vpop.permute.xlu1 %1229  ;;  %v1232_v56 = vpop.permute.xlu0 %1231 }
 0x230   : > { %v1260_v59 = vsel %vm1235_vm10, %v1230_v18, %v1232_v56 }
 0x231   : > { %1311 = vmatpush1.bf16.msra.mxu0 %v1236_v20  ;;  %v1291_v3 = vsel %vm948_vm12, %v1260_v59, 0 }
 0x233   : > { %v1234_v60 = vpop.permute.xlu1 %1233 }
 0x234   : > { %v1261_v62 = vsel %vm1235_vm10, %v1232_v56, %v1234_v60 }
 0x235   : > { %1617 = vmatprep.subr.msk.bf16.mxu0 %vm948_vm12, %v1261_v62 }
 0x236   : > { %1319 = vmatpush2.bf16.msra.mxu0 %v1291_v3 }
 0x272   : > { %v1224_v4 = vpop.permute.xlu0 %1223 }
 0x276   : > { %v1218_v45 = vpop.permute.xlu1 %1217 }
 0x27a   : > { %v1228_v9 = vpop.permute.xlu1 %1227  ;;  %v1212_v21 = vpop.permute.xlu0 %1211 }
 0x27e   : > { %v1220_v5 = vpop.permute.xlu1 %1219  ;;  %v1226_v24 = vpop.permute.xlu0 %1225 }
 0x27f   : > { %v1259_v51 = vsel %vm1235_vm10, %v1226_v24, %v1228_v9  ;;  %v1258_v26 = vsel %vm1235_vm10, %v1224_v4, %v1226_v24  ;;  %v1256_v49 = vsel %vm1235_vm10, %v1218_v45, %v1220_v5 }
 0x280   : > { %1320 = vmatprep.subr.bf16.mxu0 %v1259_v51 }
 0x281   : > { %1321 = vmatpush2.bf16.msra.mxu0 %v1258_v26 }
 0x282   : > { %v1216_v48 = vpop.permute.xlu1 %1215  ;;  %v1222_v12 = vpop.permute.xlu0 %1221 }
 0x283   : > { %v1257_v6 = vsel %vm1235_vm10, %v1220_v5, %v1222_v12 }
 0x284   : > { %1322 = vmatprep.subr.bf16.mxu0 %v1257_v6 }
 0x285   : > { %1323 = vmatpush2.bf16.msra.mxu0 %v1256_v49 }
 0x286   : > { %v1208_v29 = vpop.permute.xlu1 %1207  ;;  %v1214_v28 = vpop.permute.xlu0 %1213 }
 0x287   : > { %v1255_v31 = vsel %vm1235_vm10, %v1214_v28, %v1216_v48  ;;  %v1254_v10 = vsel %vm1235_vm10, %v1212_v21, %v1214_v28 }
 0x288   : > { %1324 = vmatprep.subr.bf16.mxu0 %v1255_v31 }
 0x289   : > { %1325 = vmatpush2.bf16.msra.mxu0 %v1254_v10 }
 0x28a   : > { %v1206_v52 = vpop.permute.xlu1 %1205  ;;  %v1210_v58 = vpop.permute.xlu0 %1209 }
 0x28b   : > { %v1253_v33 = vsel %vm1235_vm10, %v1208_v29, %v1210_v58  ;;  %v1252_v30 = vsel %vm1235_vm10, %v1206_v52, %v1208_v29 }
 0x28c   : > { %1326 = vmatprep.subr.bf16.mxu0 %v1253_v33 }
 0x28d   : > { %1327 = vmatpush2.bf16.msra.mxu0 %v1252_v30 }
 0x290   : > { %1329 = vmatmul.mubr.bf16.vlgmr.msra.gmra.mxu0 %v1615_v35 }
 0x350   : > { %v1330_v0 = vpop.f32.mrf.mxu0 }
 0x351   : > { %v1337_v61 = vmul.f32 %v1330_v0, %v1926_v38 }
 0x352   : > { %v1332_v14 = vpop.f32.mrf.mxu0 }
 0x353   : > { %v1338_v16 = vmul.f32 %v1332_v14, %v1928_v39  ;;  %1351 = sbr.rel (%p1620_p9) target bundleno = 858 (0x35a), region = 60 }
 0x354   : > { %v1334_v32 = vpop.f32.mrf.mxu0 }
 0x355   : > { %v1653_v37 = vpack.c.bf16 %v1338_v16, %v1337_v61 }
 0x356   : > { %v1335_v41 = vpop.f32.mrf.mxu0 }
 0x357   : > { %1347 = vst [vmem:[%s674_s30] sm:$0xff] %v1653_v37 }
 0x358   : > { %vm1352_vm12 = vcmask 7168   ;;  %v1786_v55 = vmov 0.0  }
 0x359   : > { %1353 = vst.msk [vmem:[%s2214_s26] sm:$0xff] %vm1352_vm12, %v1786_v55  ;;  %1354 = vst.msk [vmem:[%s2219_s18] sm:$0xff] %vm1352_vm12, %v1786_v55 }
 0x35a PF: > { %v1356_v38 = vadd.f32 %v1338_v16, %v1337_v61  ;;  %v1363_v39 = vmul.f32 %v1337_v61, %v1337_v61  ;;  %v1364_v8 = vmul.f32 %v1338_v16, %v1338_v16  ;;  %vm1360_vm13 = vcmask 7168  }
 0x35c   : > { %1357 = vadd.xlane.f32.xlu0 %v1356_v38  ;;  %v1365_v19 = vadd.f32 %v1364_v8, %v1363_v39 }
 0x360   : > { %1366 = vadd.xlane.f32.xlu0 %v1365_v19  ;;  %v1355_v40 = vld [vmem:[%s2214_s26] sm:$0xff] }
 0x361   : > { %v1362_v7 = vld [vmem:[%s2219_s18] sm:$0xff] }
 0x3e5   : > { %v1358_v2 = vpop.xlane.xlu0 %1357 }
 0x3e6   : > { %v1359_v53 = vadd.f32 %v1358_v2, %v1355_v40 }
 0x3e8   : > { %1361 = vst.msk [vmem:[%s2214_s26] sm:$0xff] %vm1360_vm13, %v1359_v53 }
 0x3e9   : > { %v1367_v23 = vpop.xlane.xlu0 %1366 }
 0x3ea   : > { %v1368_v11 = vadd.f32 %v1367_v23, %v1362_v7 }
 0x3ec   : > { %1369 = vst.msk [vmem:[%s2219_s18] sm:$0xff] %vm1360_vm13, %v1368_v11 }
 0x3ed PF: > { %s22_s21 = sadd.s32 1, %s1765_s21   ;;  %s2394_s17 = smov %s1757_s19 }
 0x3ee   : > { %p19_p10 = scmp.ge.s32.totalorder %s22_s21, 6   ;;  %s2395_s18 = smov %s1761_s20 }
 0x3ef   : > { %s2396_s19 = smov %s2399_s22  ;;  %s2397_s20 = smov %s2403_s23 }
 0x3f0   :  { %21 = sbr.rel (!%p19_p10) target bundleno = 3 (0x3), region = 129 }

</bundles_post_ra>
